<compile_context>
chip_gen: v6e
topology: v6e:2x2x1
jax: 0.10.0
libtpu: 0.0.40
codegen_flags: <defaults>
</compile_context>

<pallas_src>
from functools import partial

import jax
import jax.numpy as jnp
from jax.experimental import pallas as pl
from jax.experimental.pallas import tpu as pltpu


def _conv_im2col_kernel(x_ref, w_ref, b_ref, o_ref, *, kh, kw, stride,
                        tile_oh, ow, ocp, apply_act, row_axis):
    """One (batch, row-tile) grid step.

    x_ref: (Hp, Wp, C)          padded NHWC image for this batch (compute dtype)
    w_ref: (KH*KW*C, OCp)       conv weight, rows ordered (dy, dx, c), OC padded
    b_ref: (1, OCp)             bias (f32)
    o_ref: (tile_oh, OW, OCp)   output tile (lane-dense last dim)
    """
    i = pl.program_id(row_axis)                           # row-tile index
    row_step = tile_oh * stride
    r0 = pl.multiple_of(i * row_step, row_step)           # first padded-input row of tile
    c_in = x_ref.shape[-1]

    # Per-tile im2col slab: concatenate the KH*KW shifted patches along the lane
    # axis (tap-major, matching w_ref's row order) and contract in ONE MXU GEMM.
    taps = []
    for dy in range(kh):
        for dx in range(kw):
            if stride == 1:
                rows = pl.ds(r0 + dy, tile_oh)
                cols = pl.ds(dx, ow)
            else:
                # TODO(synk): for stride >= 2, check the Mosaic dump for relayout
                # copies from these strided reads; if present, load the contiguous
                # row slab once per dy and lane-select the strided columns.
                rows = pl.ds(r0 + dy, tile_oh, stride)
                cols = pl.ds(dx, ow, stride)
            taps.append(x_ref[rows, cols, :])
    slab = jnp.concatenate(taps, axis=-1).reshape(tile_oh * ow, kh * kw * c_in)

    acc = jnp.dot(slab, w_ref[...], preferred_element_type=jnp.float32)
    acc = acc + b_ref[...]                                # (1, OCp) broadcasts over rows
    if apply_act:                                         # F.leaky_relu, slope 0.01
        acc = jnp.where(acc > 0.0, acc, 0.01 * acc)
    o_ref[...] = acc.reshape(tile_oh, ow, ocp).astype(o_ref.dtype)


def conv_layer_forward(x, weight, bias, *, kernel_size, stride, is_last=False,
                       target_block_rows=None, compute_dtype=jnp.bfloat16):
    """x: (N, C, H, W). weight: (OC, IC, KH, KW). bias: (OC,). Returns (N, OC, OH, OW)."""
    n, c, h, w = x.shape
    oc, ic, kh, kw = weight.shape
    assert ic == c and kh == kernel_size and kw == kernel_size

    pad = int(kernel_size // 2)
    # ReflectionPad2d constraint (same as PyTorch): pad must be < spatial dims.
    assert h > pad and w > pad, "ReflectionPad2d requires H, W > kernel_size // 2"

    out_dtype = x.dtype

    # --- layout: NCHW -> NHWC once at the layer boundary; cast to the MXU compute
    # dtype BEFORE padding so the pad passes move half the bytes.
    # TODO(synk): when chaining ConvLayers, keep activations NHWC between layers so
    # these transposes only happen at network boundaries.
    x_nhwc = jnp.transpose(x, (0, 2, 3, 1)).astype(compute_dtype)
    xp = jnp.pad(x_nhwc, ((0, 0), (pad, pad), (pad, pad), (0, 0)), mode="reflect")
    hp, wp = h + 2 * pad, w + 2 * pad
    oh = (hp - kh) // stride + 1
    ow = (wp - kw) // stride + 1

    # --- output-channel padding: lane-dense stores (>=128); multiples of 256 past
    # 128 so the 256-wide MXU on v6e/v7x is filled. Never inflate past 128 when
    # OC <= 128 (that would only multiply wasted compute / output HBM writes).
    ocp = 128 if oc <= 128 else (-(-oc // 256) * 256)

    ktot = kh * kw * c
    # weight (OC, IC, KH, KW) -> (KH*KW*C, OCp); row order (dy, dx, c) matches the
    # kernel's tap concatenation order.
    w_mat = jnp.transpose(weight, (2, 3, 1, 0)).reshape(ktot, oc)
    w_mat = jnp.pad(w_mat, ((0, 0), (0, ocp - oc))).astype(compute_dtype)
    b_mat = jnp.pad(bias, (0, ocp - oc)).reshape(1, ocp).astype(jnp.float32)

    # --- generation-aware VMEM budget & tile sizing ----------------------------
    try:
        vmem_cap = int(pltpu.get_tpu_info().vmem_capacity_bytes)
    except Exception:
        vmem_cap = 64 * 1024 * 1024                 # conservative (v7x per-TC)
    budget = int(vmem_cap * 0.6)                    # ~38 MiB v7x, ~77 MiB v5e/v6e
    if target_block_rows is None:
        target_block_rows = 2048 if vmem_cap >= (96 << 20) else 1024

    cd_isz = jnp.dtype(compute_dtype).itemsize
    out_isz = jnp.dtype(out_dtype).itemsize

    def _footprint(t_oh, img_bufs):
        n_tiles = -(-oh // t_oh)
        hp_need = max(hp, (n_tiles * t_oh - 1) * stride + kh)
        m = t_oh * ow
        img = img_bufs * hp_need * wp * c * cd_isz          # resident image block
        wgt = 2 * ktot * ocp * cd_isz + 2 * ocp * 4         # weight + bias (dbl-buf)
        out_t = 2 * m * ocp * out_isz                       # output tile (dbl-buf)
        work = m * ktot * cd_isz + m * ocp * 4              # im2col slab + f32 acc
        return img + wgt + out_t + int(1.25 * work)

    # Single-buffer the image block if its double-buffered copy alone would
    # dominate the budget (v7x 64 MiB) -- it only changes once per batch.
    img_bufs = 2
    if 2 * hp * wp * c * cd_isz > budget // 2:
        img_bufs = 1
    # TODO(synk): if even a single-buffered whole padded image cannot fit VMEM
    # (very large H*W*C on v7x), switch the image input to memory_space=pl.ANY and
    # DMA haloed row slabs (tile_oh*stride + kh - stride rows) with
    # pltpu.make_async_copy double-buffering.

    tile_oh = max(1, min(oh, target_block_rows // max(1, ow)))
    while tile_oh > 1 and _footprint(tile_oh, img_bufs) > budget:
        tile_oh = (tile_oh + 1) // 2

    n_row_tiles = -(-oh // tile_oh)
    ohp = n_row_tiles * tile_oh
    needed_hp = (ohp - 1) * stride + kh
    if needed_hp > hp:
        # Extra zero rows so row tiles in the OH padding never read out of bounds
        # (their outputs are sliced off below, never fed back).
        xp = jnp.pad(xp, ((0, 0), (0, needed_hp - hp), (0, 0), (0, 0)))
    hp_pad = xp.shape[1]

    # --- grid: megacore-robust ordering ---------------------------------------
    if n == 1:
        # batch=1: the row-tile axis is the only parallel axis, so both v7x TCs work.
        grid = (n_row_tiles,)
        row_axis = 0
        dims = ("parallel",)
        img_map = lambda i: (0, 0, 0, 0)
        w_map = lambda i: (0, 0)
        b_map = lambda i: (0, 0)
        o_map = lambda i: (0, i, 0, 0)
    else:
        # Batch outer so the image block index is constant across the inner row
        # axis and the padded image is fetched only once per batch.
        grid = (n, n_row_tiles)
        row_axis = 1
        dims = ("parallel", "parallel")
        img_map = lambda b, i: (b, 0, 0, 0)
        w_map = lambda b, i: (0, 0)
        b_map = lambda b, i: (0, 0)
        o_map = lambda b, i: (b, i, 0, 0)

    img_spec_kwargs = {}
    if img_bufs == 1:
        img_spec_kwargs["pipeline_mode"] = pl.Buffered(1)
    in_specs = [
        pl.BlockSpec((None, hp_pad, wp, c), img_map, **img_spec_kwargs),
        pl.BlockSpec((ktot, ocp), w_map),
        pl.BlockSpec((1, ocp), b_map),
    ]
    out_specs = pl.BlockSpec((None, tile_oh, ow, ocp), o_map)

    kernel = partial(_conv_im2col_kernel, kh=kh, kw=kw, stride=stride,
                     tile_oh=tile_oh, ow=ow, ocp=ocp, apply_act=not is_last,
                     row_axis=row_axis)

    fp = _footprint(tile_oh, img_bufs)
    vmem_limit = int(min(0.71 * vmem_cap, max(1.3 * fp, 24 * 1024 * 1024)))

    flops = 2 * n * oh * ow * ktot * oc             # real channels (scheduler hint)
    bytes_accessed = (n * hp_pad * wp * c * cd_isz          # input (read once/batch)
                      + ktot * ocp * cd_isz + ocp * 4       # weight + bias
                      + n * ohp * ow * ocp * out_isz)       # output

    out = pl.pallas_call(
        kernel,
        out_shape=jax.ShapeDtypeStruct((n, ohp, ow, ocp), out_dtype),
        grid_spec=pltpu.PrefetchScalarGridSpec(
            num_scalar_prefetch=0,
            grid=grid,
            in_specs=in_specs,
            out_specs=out_specs,
        ),
        compiler_params=pltpu.CompilerParams(
            dimension_semantics=dims,
            vmem_limit_bytes=vmem_limit),
        cost_estimate=pl.CostEstimate(flops=flops, transcendentals=0,
                                      bytes_accessed=bytes_accessed),
    )(xp, w_mat, b_mat)

    # Drop OH / OC padding and return to NCHW in one fused wrapper expression.
    return jnp.transpose(out[:, :oh, :, :oc], (0, 3, 1, 2))


if __name__ == "__main__":
    # Shapes consistent with the module: N=2, C_in=4, H=W=16, C_out=8, k=3, stride=1.
    key = jax.random.PRNGKey(0)
    kx, kw_, kb = jax.random.split(key, 3)

    N, C_IN, H, W = 2, 4, 16, 16
    C_OUT, K, STRIDE = 8, 3, 1

    x = jax.random.normal(kx, (N, C_IN, H, W), dtype=jnp.float32)
    weight = jax.random.normal(kw_, (C_OUT, C_IN, K, K), dtype=jnp.float32) * 0.1
    bias = jax.random.normal(kb, (C_OUT,), dtype=jnp.float32) * 0.1

    fwd = jax.jit(partial(conv_layer_forward, kernel_size=K, stride=STRIDE,
                          is_last=False))
    out = fwd(x, weight, bias)
    jax.block_until_ready(out)
    assert out.shape == (N, C_OUT, H, W), out.shape

    # f32 XLA reference of the same forward (reflect pad -> conv -> leaky_relu).
    pad = K // 2
    xr = jnp.pad(x, ((0, 0), (0, 0), (pad, pad), (pad, pad)), mode="reflect")
    ref = jax.lax.conv_general_dilated(
        xr, weight, window_strides=(STRIDE, STRIDE), padding="VALID",
        dimension_numbers=("NCHW", "OIHW", "NCHW"))
    ref = ref + bias.reshape(1, C_OUT, 1, 1)
    ref = jnp.where(ref > 0.0, ref, 0.01 * ref)
    max_err = float(jnp.max(jnp.abs(out - ref)))
    # bf16 MXU operands with f32 accumulation -> small tolerance vs f32 reference.
    assert max_err < 5e-2, f"max abs error {max_err}"
    print("KERNEL_OK")
</pallas_src>

<mosaic_0001>
module attributes {stable_mosaic.version = 11 : i64} {
  func.func @_conv_im2col_kernel(%arg0: i32, %arg1: i32, %arg2: memref<1x18x18x4xbf16, #tpu.memory_space<vmem>>, %arg3: memref<36x128xbf16, #tpu.memory_space<vmem>>, %arg4: memref<1x128xf32, #tpu.memory_space<vmem>>, %arg5: memref<1x16x16x128xf32, #tpu.memory_space<vmem>>) attributes {dimension_semantics = [#tpu.dimension_semantics<parallel>, #tpu.dimension_semantics<parallel>], iteration_bounds = array<i64: 2, 1>, scalar_prefetch = 0 : i64, scratch_operands = 0 : i64, tpu.core_type = #tpu.core_type<tc>, window_params = [{transform_indices = @transform_0, window_bounds = array<i64: 1, 18, 18, 4>}, {pipeline_mode = #tpu.pipeline_mode<synchronous>, transform_indices = @transform_1, window_bounds = array<i64: 36, 128>}, {pipeline_mode = #tpu.pipeline_mode<synchronous>, transform_indices = @transform_2, window_bounds = array<i64: 1, 128>}, {transform_indices = @transform_3, window_bounds = array<i64: 1, 16, 16, 128>}]} {
    %c16_i32 = arith.constant 16 : i32
    %0 = arith.muli %arg1, %c16_i32 : i32
    %1 = tpu.assume_multiple %0, 16 : i32
    %c0_i32 = arith.constant 0 : i32
    %2 = arith.addi %1, %c0_i32 : i32
    %c0 = arith.constant 0 : index
    %3 = arith.index_cast %2 : i32 to index
    %c0_0 = arith.constant 0 : index
    %c0_1 = arith.constant 0 : index
    %4 = vector.load %arg2[%c0, %3, %c0_0, %c0_1] : memref<1x18x18x4xbf16, #tpu.memory_space<vmem>>, vector<1x16x16x4xbf16>
    %5 = vector.shape_cast %4 : vector<1x16x16x4xbf16> to vector<16x16x4xbf16>
    %c0_i32_2 = arith.constant 0 : i32
    %6 = arith.addi %1, %c0_i32_2 : i32
    %c0_3 = arith.constant 0 : index
    %7 = arith.index_cast %6 : i32 to index
    %c1 = arith.constant 1 : index
    %c0_4 = arith.constant 0 : index
    %8 = vector.load %arg2[%c0_3, %7, %c1, %c0_4] : memref<1x18x18x4xbf16, #tpu.memory_space<vmem>>, vector<1x16x16x4xbf16>
    %9 = vector.shape_cast %8 : vector<1x16x16x4xbf16> to vector<16x16x4xbf16>
    %c0_i32_5 = arith.constant 0 : i32
    %10 = arith.addi %1, %c0_i32_5 : i32
    %c0_6 = arith.constant 0 : index
    %11 = arith.index_cast %10 : i32 to index
    %c2 = arith.constant 2 : index
    %c0_7 = arith.constant 0 : index
    %12 = vector.load %arg2[%c0_6, %11, %c2, %c0_7] : memref<1x18x18x4xbf16, #tpu.memory_space<vmem>>, vector<1x16x16x4xbf16>
    %13 = vector.shape_cast %12 : vector<1x16x16x4xbf16> to vector<16x16x4xbf16>
    %c1_i32 = arith.constant 1 : i32
    %14 = arith.addi %1, %c1_i32 : i32
    %c0_8 = arith.constant 0 : index
    %15 = arith.index_cast %14 : i32 to index
    %c0_9 = arith.constant 0 : index
    %c0_10 = arith.constant 0 : index
    %16 = vector.load %arg2[%c0_8, %15, %c0_9, %c0_10] : memref<1x18x18x4xbf16, #tpu.memory_space<vmem>>, vector<1x16x16x4xbf16>
    %17 = vector.shape_cast %16 : vector<1x16x16x4xbf16> to vector<16x16x4xbf16>
    %c1_i32_11 = arith.constant 1 : i32
    %18 = arith.addi %1, %c1_i32_11 : i32
    %c0_12 = arith.constant 0 : index
    %19 = arith.index_cast %18 : i32 to index
    %c1_13 = arith.constant 1 : index
    %c0_14 = arith.constant 0 : index
    %20 = vector.load %arg2[%c0_12, %19, %c1_13, %c0_14] : memref<1x18x18x4xbf16, #tpu.memory_space<vmem>>, vector<1x16x16x4xbf16>
    %21 = vector.shape_cast %20 : vector<1x16x16x4xbf16> to vector<16x16x4xbf16>
    %c1_i32_15 = arith.constant 1 : i32
    %22 = arith.addi %1, %c1_i32_15 : i32
    %c0_16 = arith.constant 0 : index
    %23 = arith.index_cast %22 : i32 to index
    %c2_17 = arith.constant 2 : index
    %c0_18 = arith.constant 0 : index
    %24 = vector.load %arg2[%c0_16, %23, %c2_17, %c0_18] : memref<1x18x18x4xbf16, #tpu.memory_space<vmem>>, vector<1x16x16x4xbf16>
    %25 = vector.shape_cast %24 : vector<1x16x16x4xbf16> to vector<16x16x4xbf16>
    %c2_i32 = arith.constant 2 : i32
    %26 = arith.addi %1, %c2_i32 : i32
    %c0_19 = arith.constant 0 : index
    %27 = arith.index_cast %26 : i32 to index
    %c0_20 = arith.constant 0 : index
    %c0_21 = arith.constant 0 : index
    %28 = vector.load %arg2[%c0_19, %27, %c0_20, %c0_21] : memref<1x18x18x4xbf16, #tpu.memory_space<vmem>>, vector<1x16x16x4xbf16>
    %29 = vector.shape_cast %28 : vector<1x16x16x4xbf16> to vector<16x16x4xbf16>
    %c2_i32_22 = arith.constant 2 : i32
    %30 = arith.addi %1, %c2_i32_22 : i32
    %c0_23 = arith.constant 0 : index
    %31 = arith.index_cast %30 : i32 to index
    %c1_24 = arith.constant 1 : index
    %c0_25 = arith.constant 0 : index
    %32 = vector.load %arg2[%c0_23, %31, %c1_24, %c0_25] : memref<1x18x18x4xbf16, #tpu.memory_space<vmem>>, vector<1x16x16x4xbf16>
    %33 = vector.shape_cast %32 : vector<1x16x16x4xbf16> to vector<16x16x4xbf16>
    %c2_i32_26 = arith.constant 2 : i32
    %34 = arith.addi %1, %c2_i32_26 : i32
    %c0_27 = arith.constant 0 : index
    %35 = arith.index_cast %34 : i32 to index
    %c2_28 = arith.constant 2 : index
    %c0_29 = arith.constant 0 : index
    %36 = vector.load %arg2[%c0_27, %35, %c2_28, %c0_29] : memref<1x18x18x4xbf16, #tpu.memory_space<vmem>>, vector<1x16x16x4xbf16>
    %37 = vector.shape_cast %36 : vector<1x16x16x4xbf16> to vector<16x16x4xbf16>
    %38 = tpu.concatenate %5, %9, %13, %17, %21, %25, %29, %33, %37 in 2 : vector<16x16x4xbf16>, vector<16x16x4xbf16>, vector<16x16x4xbf16>, vector<16x16x4xbf16>, vector<16x16x4xbf16>, vector<16x16x4xbf16>, vector<16x16x4xbf16>, vector<16x16x4xbf16>, vector<16x16x4xbf16> -> vector<16x16x36xbf16>
    %39 = vector.shape_cast %38 : vector<16x16x36xbf16> to vector<256x36xbf16>
    %c0_30 = arith.constant 0 : index
    %c0_31 = arith.constant 0 : index
    %40 = vector.load %arg3[%c0_30, %c0_31] : memref<36x128xbf16, #tpu.memory_space<vmem>>, vector<36x128xbf16>
    %cst = arith.constant dense<0.000000e+00> : vector<256x128xf32>
    %41 = tpu.matmul %39, %40, %cst {dimension_numbers = #tpu.dot_dimension_numbers<[1], [0], [0], [1], [0, 0, 1, 1], [], []>} : vector<256x36xbf16>, vector<36x128xbf16>, vector<256x128xf32> -> vector<256x128xf32>
    %c0_32 = arith.constant 0 : index
    %c0_33 = arith.constant 0 : index
    %42 = vector.load %arg4[%c0_32, %c0_33] : memref<1x128xf32, #tpu.memory_space<vmem>>, vector<1x128xf32>
    %43 = vector.broadcast %42 : vector<1x128xf32> to vector<256x128xf32>
    %44 = arith.addf %41, %43 : vector<256x128xf32>
    %cst_34 = arith.constant 0.000000e+00 : f32
    %45 = vector.broadcast %cst_34 : f32 to vector<256x128xf32>
    %46 = arith.cmpf ogt, %44, %45 : vector<256x128xf32>
    %cst_35 = arith.constant 0.00999999977 : f32
    %47 = vector.broadcast %cst_35 : f32 to vector<256x128xf32>
    %48 = arith.mulf %47, %44 : vector<256x128xf32>
    %49 = arith.select %46, %44, %48 : vector<256x128xi1>, vector<256x128xf32>
    %50 = vector.shape_cast %49 : vector<256x128xf32> to vector<16x16x128xf32>
    %c0_36 = arith.constant 0 : index
    %c0_37 = arith.constant 0 : index
    %c0_38 = arith.constant 0 : index
    %c0_39 = arith.constant 0 : index
    %51 = vector.load %arg5[%c0_36, %c0_37, %c0_38, %c0_39] : memref<1x16x16x128xf32, #tpu.memory_space<vmem>>, vector<1x16x16x128xf32>
    %52 = vector.shape_cast %51 : vector<1x16x16x128xf32> to vector<16x16x128xf32>
    %53 = vector.shape_cast %50 : vector<16x16x128xf32> to vector<1x16x16x128xf32>
    tpu.vector_store %arg5[%c0_36, %c0_37, %c0_38, %c0_39], %53 {strides = array<i32>} : memref<1x16x16x128xf32, #tpu.memory_space<vmem>>, vector<1x16x16x128xf32>,
    return
  }
  func.func @transform_0(%arg0: i32, %arg1: i32) -> (i32, i32, i32, i32) {
    %c0_i32 = arith.constant 0 : i32
    %c0_i32_0 = arith.constant 0 : i32
    %c0_i32_1 = arith.constant 0 : i32
    %c0_i32_2 = arith.constant 0 : i32
    return %arg0, %c0_i32, %c0_i32_0, %c0_i32_1 : i32, i32, i32, i32
  }
  func.func @transform_1(%arg0: i32, %arg1: i32) -> (i32, i32) {
    %c0_i32 = arith.constant 0 : i32
    %c0_i32_0 = arith.constant 0 : i32
    %c0_i32_1 = arith.constant 0 : i32
    return %c0_i32, %c0_i32_0 : i32, i32
  }
  func.func @transform_2(%arg0: i32, %arg1: i32) -> (i32, i32) {
    %c0_i32 = arith.constant 0 : i32
    %c0_i32_0 = arith.constant 0 : i32
    %c0_i32_1 = arith.constant 0 : i32
    return %c0_i32, %c0_i32_0 : i32, i32
  }
  func.func @transform_3(%arg0: i32, %arg1: i32) -> (i32, i32, i32, i32) {
    %c0_i32 = arith.constant 0 : i32
    %c0_i32_0 = arith.constant 0 : i32
    %c0_i32_1 = arith.constant 0 : i32
    return %arg0, %arg1, %c0_i32, %c0_i32_0 : i32, i32, i32, i32
  }
}

</mosaic_0001>

<bundles_post_ra>
// kernel: conv_layer_forward.1
= control target key start
LH: loop header
LB: loop body
LE: loop exit
PB: predicated region body
PF: predicated region fallthrough
CT: control target
= control target key end

     0   :  { %s3221_s12 = smov 0   ;;  %s3223_s13 = smov 0   ;;  %s4545_s0 = inlined_call_operand.vmem [shape: bf16[2,18,18,4], index: 0, kind: input, shape index: {}]   ;;  %s4546_s1 = inlined_call_operand.vmem [shape: bf16[36,128], index: 1, kind: input, shape index: {}]   ;;  %s4547_s2 = inlined_call_operand.vmem [shape: f32[1,128], index: 2, kind: input, shape index: {}]   ;;  %s4548_s3 = inlined_call_operand.vmem [shape: f32[2,16,16,128], index: 3, kind: output, shape index: {}]  }
   0x1   :  { %s3225_s14 = smov 0  }
   0x2 LB: > { %s25_s15 = sadd.s32 1, %s3187_s13  ;;  %p2625_p0 = scmp.ge.s32.totalorder %s3191_s14, 1  ;;  %s3191_s14 = sphi %s3225_s14, %s13_s14   ;;  %s3187_s13 = sphi %s3223_s13, %s4565_s13   ;;  %s3183_s12 = sphi %s3221_s12, %s4564_s12  }
   0x3   : > { %p27_p1 = scmp.ge.s32.totalorder %s25_s15, 2  ;;  %p151_p2 = scmp.lt.s32.totalorder %s3191_s14, 3 }
   0x5   : > { %s4567_s15 = smov (%p27_p1, %s25_s15), 0  ;;  %p152_p3 = pnand %p2625_p0, %p151_p2 }
   0x7   : > { %155 = sbr.rel (%p152_p3) target bundleno = 597 (0x255), region = 32 }
   0xc   : > { %p180_p4 = scmp.lt.s32.totalorder %s3183_s12, 1  ;;  %s3193_s20 = smov 12   ;;  %vm802_vm0 = vcmask 1046528   ;;  %vm529_vm1 = vsmask.f32 7424  ;;  %vm2231_vm2 = vcmask 1041408  }
   0xd   : > { %s3194_s21 = smov 8   ;;  %s3195_s22 = smov 4   ;;  %vm1907_vm3 = vcmask 31744   ;;  %vm1940_vm4 = vcmask 64512   ;;  %vm1973_vm5 = vcmask 97280   ;;  %vm2006_vm6 = vcmask 130048  }
   0xe   : > { %s4569_s12 = smov (!%p180_p4, %s3183_s12), 1  ;;  %s3196_s23 = smov 16   ;;  %vm2039_vm7 = vcmask 162816   ;;  %vm2072_vm8 = vcmask 195584   ;;  %vm2105_vm9 = vcmask 228352   ;;  %vm2138_vm10 = vcmask 261120  }
   0xf   : > { %s2989_s16 = smul.u32 216, %s4569_s12  ;;  %s3197_s24 = smov 20   ;;  %vm2198_vm11 = vcmask 293888  }
  0x10   : > { %s3198_s25 = smov 24   ;;  %s3199_s26 = smov 28  }
  0x11   : > { %s3245_s19 = scalar_lea.vmem %s4545_s0, %s2989_s16  ;;  %s3200_s27 = smov 32  }
  0x12   : > { %v2645_v0 = vld [vmem:[%s3245_s19 + $0x6c] sm:$0xf]  ;;  %v3249_v1 = vld [vmem:[%s3245_s19 + $0x70] sm:$0xf]  ;;  %v218_v6 = vld [vmem:[%s3245_s19 + $0x64] sm:$0xf] }
  0x13   : > { %v3252_v2 = vcombine.low %v2645_v0, %v3249_v1  ;;  %v2629_v3 = vld [vmem:[%s3245_s19 + $0xc] sm:$0xf]  ;;  %v3256_v4 = vld [vmem:[%s3245_s19 + $0x10] sm:$0xf]  ;;  %v257_v7 = vld [vmem:[%s3245_s19 + $0x60] sm:$0xe] }
  0x14   : > { %v3259_v5 = vcombine.low %v2629_v3, %v3256_v4  ;;  %v3266_v8 = vld [vmem:[%s3245_s19 + $0x68] ss:$0 sps:$4 sm:$0x11]   ;;  %v2797_v9 = vcombine.low %v257_v7, %v218_v6  ;;  %v217_v10 = vld [vmem:[%s3245_s19 + $0x60] sm:$0xf]  ;;  %s2923_s9 = sshll.u32 %s4569_s12, 8 }
  0x15   : > { %979 = vrot.lane.b32.xlu1 %v3252_v2, %s3193_s20  ;;  %v1142_v11 = vshll.u32 %v3252_v2, 16  ;;  %v202_v12 = vld [vmem:[%s3245_s19 + $0x4] sm:$0xf]  ;;  %v828_v14 = vrot.slane %v3266_v8, 1  ;;  %v249_v15 = vld [vmem:[%s3245_s19] sm:$0xe]  ;;  %v3277_v18 = vcombine.low %v217_v10, %v218_v6  ;;  %s4472_s16 = scalar_lea.vmem %s4548_s3, %s2923_s9 }
  0x16   : > { %963 = vrot.lane.b32.xlu0 %v3259_v5, %s3193_s20  ;;  %v827_v13 = vrot.slane %v2797_v9, 1  ;;  %v201_v16 = vld [vmem:[%s3245_s19] sm:$0xf]  ;;  %v1046_v17 = vshll.u32 %v3259_v5, 16  ;;  %v2789_v20 = vcombine.low %v249_v15, %v202_v12  ;;  %v219_v21 = vld [vmem:[%s3245_s19 + $0x6c] sm:$0xf] }
  0x17   : > { %v3029_v19 = vld [vmem:[%s3245_s19 + $0x8] ss:$0 sps:$4 sm:$0x11]   ;;  %v3282_v23 = vcombine.low %v201_v16, %v202_v12  ;;  %v220_v24 = vld [vmem:[%s3245_s19 + $0x70] sm:$0xf]  ;;  %v627_v30 = vshrl.u32 %v3277_v18, 16 }
  0x18   : > { %v829_v22 = vsel %vm802_vm0, %v827_v13, %v828_v14  ;;  %v258_v25 = vld [vmem:[%s3245_s19 + $0x6c] sm:$0xe]  ;;  %v803_v26 = vrot.slane %v2789_v20, 1  ;;  %v804_v27 = vrot.slane %v3029_v19, 1  ;;  %v3289_v31 = vcombine.low %v219_v21, %v220_v24  ;;  %v204_v33 = vld [vmem:[%s3245_s19 + $0x10] sm:$0xf] }
  0x19   : > { %867 = vrot.lane.b32.xlu1 %v829_v22, %s3194_s21  ;;  %v3033_v28 = vld [vmem:[%s3245_s19 + $0x74] ss:$0 sps:$4 sm:$0x11]   ;;  %v2798_v29 = vcombine.low %v258_v25, %v220_v24  ;;  %v203_v32 = vld [vmem:[%s3245_s19 + $0xc] sm:$0xf]  ;;  %v531_v41 = vshrl.u32 %v3282_v23, 16 }
  0x1a   : > { %v805_v34 = vsel %vm802_vm0, %v803_v26, %v804_v27  ;;  %v831_v36 = vrot.slane %v3033_v28, 1  ;;  %v250_v37 = vld [vmem:[%s3245_s19 + $0xc] sm:$0xe]  ;;  %v3295_v38 = vcombine.low %v203_v32, %v204_v33  ;;  %v3036_v39 = vld [vmem:[%s3245_s19 + $0x14] ss:$0 sps:$4 sm:$0x11]  }
  0x1b   : > { %v830_v35 = vrot.slane %v2798_v29, 1  ;;  %851 = vrot.lane.b32.xlu0 %v805_v34, %s3194_s21  ;;  %v2790_v40 = vcombine.low %v250_v37, %v204_v33  ;;  %v533_v42 = vshll.u32 %v3282_v23, 16  ;;  %v538_v43 = vshll.u32 %v3029_v19, 16  ;;  %v2647_v52 = vld [vmem:[%s3245_s19 + $0x78] sm:$0xf] }
  0x1c   : > { %v543_v45 = vshrl.u32 %v3295_v38, 16  ;;  %v545_v46 = vshll.u32 %v3295_v38, 16  ;;  %v639_v47 = vshrl.u32 %v3289_v31, 16  ;;  %v807_v49 = vrot.slane %v3036_v39, 1  ;;  %v3309_v57 = vld [vmem:[%s3245_s19 + $0x7c] sm:$0xf] }
  0x1d   : > { %v832_v44 = vsel %vm802_vm0, %v830_v35, %v831_v36  ;;  %v806_v48 = vrot.slane %v2790_v40, 1  ;;  %v550_v50 = vshll.u32 %v3036_v39, 16  ;;  %v535_v51 = vrot.slane %v533_v42, 1  ;;  %v2631_v62 = vld [vmem:[%s3245_s19 + $0x18] sm:$0xf] }
  0x1e   : > { %869 = vrot.lane.b32.xlu1 %v832_v44, %s3194_s21  ;;  %v547_v53 = vrot.slane %v545_v46, 1  ;;  %v540_v54 = vrot.slane %v538_v43, 1  ;;  %v641_v55 = vshll.u32 %v3289_v31, 16  ;;  %v646_v56 = vshll.u32 %v3033_v28, 16  ;;  %v3315_v63 = vld [vmem:[%s3245_s19 + $0x1c] sm:$0xf] }
  0x1f   : > { %v808_v58 = vsel %vm802_vm0, %v806_v48, %v807_v49  ;;  %v552_v59 = vrot.slane %v550_v50, 1  ;;  %v536_v60 = vor.u32 %v535_v51, %v531_v41  ;;  %v629_v61 = vshll.u32 %v3277_v18, 16  ;;  %v3322_v13 = vld [vmem:[%s3245_s19 + $0x74] ss:$0 sps:$4 sm:$0x11]  }
  0x20   : > { %853 = vrot.lane.b32.xlu0 %v808_v58, %s3194_s21  ;;  %v548_v0 = vor.u32 %v547_v53, %v543_v45  ;;  %v643_v3 = vrot.slane %v641_v55, 1  ;;  %v648_v6 = vrot.slane %v646_v56, 1  ;;  %v634_v7 = vshll.u32 %v3266_v8, 16  ;;  %v3327_v20 = vld [vmem:[%s3245_s19 + $0x14] ss:$0 sps:$4 sm:$0x11]  }
  0x21   : > { %v541_v9 = vsel %vm529_vm1, %v536_v60, %v540_v54  ;;  %v631_v10 = vrot.slane %v629_v61, 1  ;;  %v2814_v12 = vcombine.low %v2647_v52, %v3309_v57  ;;  %v2806_v19 = vcombine.low %v2631_v62, %v3315_v63  ;;  %v3334_v24 = vld [vmem:[%s3245_s19 + $0x80] ss:$0 sps:$4 sm:$0x11]   ;;  %v2685_v35 = vld [vmem:[%s3245_s19 + $0x6c] sm:$0xe] }
  0x22   : > { %v553_v14 = vsel %vm529_vm1, %v548_v0, %v552_v59  ;;  %v644_v15 = vor.u32 %v643_v3, %v639_v47  ;;  %v636_v16 = vrot.slane %v634_v7, 1  ;;  %v1140_v21 = vshrl.u32 %v3252_v2, 16  ;;  %v2677_v43 = vld [vmem:[%s3245_s19 + $0xc] sm:$0xe]  ;;  %v2686_v45 = vld [vmem:[%s3245_s19 + $0x78] sm:$0xe] }
  0x23   : > { %724 = vrot.lane.b32.xlu1 %v553_v14, %s3195_s22  ;;  %v632_v8 = vor.u32 %v631_v10, %v627_v30  ;;  %v1144_v22 = vrot.slane %v1142_v11, 1  ;;  %v1154_v26 = vshll.u32 %v2814_v12, 16  ;;  %v1147_v27 = vshll.u32 %v3322_v13, 16  ;;  %v3345_v11 = vld [vmem:[%s3245_s19 + $0x20] ss:$0 sps:$4 sm:$0x11]  }
  0x24   : > { %722 = vrot.lane.b32.xlu0 %v541_v9, %s3195_s22  ;;  %v649_v25 = vsel %vm529_vm1, %v644_v15, %v648_v6  ;;  %v1044_v28 = vshrl.u32 %v3259_v5, 16  ;;  %v1058_v30 = vshll.u32 %v2806_v19, 16  ;;  %v1048_v32 = vrot.slane %v1046_v17, 1  ;;  %v2678_v50 = vld [vmem:[%s3245_s19 + $0x18] sm:$0xe] }
  0x25   : > { %v637_v29 = vsel %vm529_vm1, %v632_v8, %v636_v16  ;;  %v1051_v2 = vshll.u32 %v3327_v20, 16  ;;  %v1145_v33 = vor.u32 %v1144_v22, %v1140_v21  ;;  %v1149_v34 = vrot.slane %v1147_v27, 1  ;;  %v2709_v55 = vld [vmem:[%s3245_s19 + $0x78] sm:$0xf]  ;;  %v3365_v56 = vld [vmem:[%s3245_s19 + $0x7c] sm:$0xf] }
  0x26   : > { %v1049_v36 = vor.u32 %v1048_v32, %v1044_v28  ;;  %v1152_v37 = vshrl.u32 %v2814_v12, 16  ;;  %v1156_v39 = vrot.slane %v1154_v26, 1  ;;  %v1159_v5 = vshll.u32 %v3334_v24, 16  ;;  %v2693_v3 = vld [vmem:[%s3245_s19 + $0x18] sm:$0xf] }
  0x27   : > { %740 = vrot.lane.b32.xlu1 %v649_v25, %s3195_s22  ;;  %v1053_v17 = vrot.slane %v1051_v2, 1  ;;  %v1056_v40 = vshrl.u32 %v2806_v19, 16  ;;  %v1060_v41 = vrot.slane %v1058_v30, 1  ;;  %v1063_v42 = vshll.u32 %v3345_v11, 16  ;;  %v3376_v6 = vld [vmem:[%s3245_s19 + $0x1c] sm:$0xf] }
  0x28   : > { %738 = vrot.lane.b32.xlu0 %v637_v29, %s3195_s22  ;;  %v2845_v44 = vcombine.low %v2685_v35, %v3249_v1  ;;  %v1150_v46 = vsel %vm529_vm1, %v1145_v33, %v1149_v34  ;;  %v1157_v47 = vor.u32 %v1156_v39, %v1152_v37  ;;  %v1161_v48 = vrot.slane %v1159_v5, 1  ;;  %v2695_v16 = vld [vmem:[%s3245_s19 + $0x24] sm:$0xf]  ;;  %v3396_v21 = vld [vmem:[%s3245_s19 + $0x80] ss:$0 sps:$4 sm:$0x11]  }
  0x29   : > { %v2837_v49 = vcombine.low %v2677_v43, %v3256_v4  ;;  %v1054_v51 = vsel %vm529_vm1, %v1049_v36, %v1053_v17  ;;  %v1061_v52 = vor.u32 %v1060_v41, %v1056_v40  ;;  %v1065_v53 = vrot.slane %v1063_v42, 1  ;;  %v3403_v27 = vld [vmem:[%s3245_s19 + $0x20] ss:$0 sps:$4 sm:$0x11]   ;;  %v221_v37 = vld [vmem:[%s3245_s19 + $0x78] sm:$0xf] }
  0x2a   : > { %v1339_v1 = vrot.slane %v2845_v44, 1  ;;  %v1340_v54 = vrot.slane %v3322_v13, 1  ;;  %v2846_v58 = vcombine.low %v2686_v45, %v3309_v57  ;;  %v2838_v4 = vcombine.low %v2678_v50, %v3315_v63  ;;  %v2711_v63 = vld [vmem:[%s3245_s19 + $0x84] sm:$0xf]  ;;  %v3385_v13 = vld [vmem:[%s3245_s19 + $0x88] sm:$0xf] }
  0x2b   : > { %981 = vrot.lane.b32.xlu1 %v2814_v12, %s3193_s20  ;;  %v1162_v59 = vsel %vm529_vm1, %v1157_v47, %v1161_v48  ;;  %v1066_v60 = vsel %vm529_vm1, %v1061_v52, %v1065_v53  ;;  %v1315_v61 = vrot.slane %v2837_v49, 1  ;;  %v1316_v62 = vrot.slane %v3327_v20, 1  ;;  %v3412_v34 = vld [vmem:[%s3245_s19 + $0x2c] ss:$0 sps:$4 sm:$0x11]  }
  0x2c   : > { %965 = vrot.lane.b32.xlu0 %v2806_v19, %s3193_s20  ;;  %v2861_v0 = vcombine.low %v2709_v55, %v3365_v56  ;;  %v1341_v57 = vsel %vm802_vm0, %v1339_v1, %v1340_v54  ;;  %v1342_v7 = vrot.slane %v2846_v58, 1  ;;  %v1343_v9 = vrot.slane %v3334_v24, 1  ;;  %v3391_v19 = vld [vmem:[%s3245_s19 + $0x28] sm:$0xf]  ;;  %v3417_v39 = vld [vmem:[%s3245_s19 + $0x7c] sm:$0xf] }
  0x2d   : > { %v1318_v10 = vrot.slane %v2838_v4, 1  ;;  %v1319_v12 = vrot.slane %v3345_v11, 1  ;;  %v1317_v14 = vsel %vm802_vm0, %v1315_v61, %v1316_v62  ;;  %v2853_v15 = vcombine.low %v2693_v3, %v3376_v6  ;;  %v3408_v11 = vld [vmem:[%s3245_s19 + $0x8c] ss:$0 sps:$4 sm:$0x11]  }
  0x2e   : > { %v1654_v20 = vshll.u32 %v2861_v0, 16  ;;  %v2862_v8 = vcombine.low %v2711_v63, %v3385_v13  ;;  %v1344_v22 = vsel %vm802_vm0, %v1342_v7, %v1343_v9  ;;  %v2854_v24 = vcombine.low %v2695_v16, %v3391_v19  ;;  %v205_v17 = vld [vmem:[%s3245_s19 + $0x18] sm:$0xf]  ;;  %v3421_v40 = vld [vmem:[%s3245_s19 + $0x1c] sm:$0xf] }
  0x2f   : > { %1251 = vrot.lane.b32.xlu1 %v1150_v46, %s3196_s23  ;;  %v1320_v25 = vsel %vm802_vm0, %v1318_v10, %v1319_v12  ;;  %v1558_v26 = vshll.u32 %v2853_v15, 16  ;;  %v1652_v28 = vshrl.u32 %v2861_v0, 16  ;;  %v1659_v32 = vshll.u32 %v3396_v21, 16  ;;  %v2749_v41 = vld [vmem:[%s3245_s19 + $0x78] sm:$0xe] }
  0x30   : > { %1235 = vrot.lane.b32.xlu0 %v1054_v51, %s3196_s23  ;;  %v1656_v29 = vrot.slane %v1654_v20, 1  ;;  %v1666_v30 = vshll.u32 %v2862_v8, 16  ;;  %v1556_v2 = vshrl.u32 %v2853_v15, 16  ;;  %v1570_v33 = vshll.u32 %v2854_v24, 16  ;;  %v2741_v46 = vld [vmem:[%s3245_s19 + $0x18] sm:$0xe] }
  0x31   : > { %v1560_v35 = vrot.slane %v1558_v26, 1  ;;  %v1563_v36 = vshll.u32 %v3403_v27, 16  ;;  %v1661_v42 = vrot.slane %v1659_v32, 1  ;;  %v1664_v43 = vshrl.u32 %v2862_v8, 16  ;;  %v207_v9 = vld [vmem:[%s3245_s19 + $0x24] sm:$0xf] }
  0x32   : > { %v1657_v5 = vor.u32 %v1656_v29, %v1652_v28  ;;  %v1668_v44 = vrot.slane %v1666_v30, 1  ;;  %v1671_v45 = vshll.u32 %v3408_v11, 16  ;;  %v1568_v47 = vshrl.u32 %v2854_v24, 16  ;;  %v3439_v4 = vld [vmem:[%s3245_s19 + $0x80] ss:$0 sps:$4 sm:$0x11]  }
  0x33   : > { %1253 = vrot.lane.b32.xlu1 %v1162_v59, %s3196_s23  ;;  %v1572_v48 = vrot.slane %v1570_v33, 1  ;;  %v1575_v49 = vshll.u32 %v3412_v34, 16  ;;  %v3430_v50 = vcombine.low %v221_v37, %v3417_v39  ;;  %v1561_v51 = vor.u32 %v1560_v35, %v1556_v2  ;;  %v3456_v10 = vld [vmem:[%s3245_s19 + $0x28] sm:$0xf]  ;;  %v2750_v12 = vld [vmem:[%s3245_s19 + $0x84] sm:$0xe] }
  0x34   : > { %1237 = vrot.lane.b32.xlu0 %v1066_v60, %s3196_s23  ;;  %v1565_v52 = vrot.slane %v1563_v36, 1  ;;  %v3433_v53 = vcombine.low %v205_v17, %v3421_v40  ;;  %v2893_v1 = vcombine.low %v2749_v41, %v3365_v56  ;;  %v2885_v54 = vcombine.low %v2741_v46, %v3376_v6  ;;  %v3445_v56 = vld [vmem:[%s3245_s19 + $0x20] ss:$0 sps:$4 sm:$0x11]   ;;  %v223_v6 = vld [vmem:[%s3245_s19 + $0x84] sm:$0xf] }
  0x35   : > { %v1669_v55 = vor.u32 %v1668_v44, %v1664_v43  ;;  %v1673_v58 = vrot.slane %v1671_v45, 1  ;;  %v1662_v59 = vsel %vm529_vm1, %v1657_v5, %v1661_v42  ;;  %v1573_v60 = vor.u32 %v1572_v48, %v1568_v47  ;;  %v3481_v36 = vld [vmem:[%s3245_s19 + $0x8c] ss:$0 sps:$4 sm:$0x11]  }
  0x36   : > { %v1577_v61 = vrot.slane %v1575_v49, 1  ;;  %v653_v62 = vshll.u32 %v3430_v50, 16  ;;  %v557_v3 = vshll.u32 %v3433_v53, 16  ;;  %v1851_v63 = vrot.slane %v2893_v1, 1 }
  0x37   : > { %1379 = vrot.lane.b32.xlu1 %v1341_v57, %s3197_s24  ;;  %v3451_v57 = vld [vmem:[%s3245_s19 + $0x88] sm:$0xf]  ;;  %v1852_v7 = vrot.slane %v3396_v21, 1  ;;  %v1828_v16 = vrot.slane %v3403_v27, 1  ;;  %v658_v20 = vshll.u32 %v3439_v4, 16  ;;  %v555_v26 = vshrl.u32 %v3433_v53, 16 }
  0x38   : > { %1363 = vrot.lane.b32.xlu0 %v1317_v14, %s3197_s24  ;;  %v1674_v14 = vsel %vm529_vm1, %v1669_v55, %v1673_v58  ;;  %v1578_v21 = vsel %vm529_vm1, %v1573_v60, %v1577_v61  ;;  %v559_v28 = vrot.slane %v557_v3, 1  ;;  %v562_v27 = vshll.u32 %v3445_v56, 16 }
  0x39   : > { %v3473_v29 = vcombine.low %v207_v9, %v3456_v10  ;;  %v2894_v30 = vcombine.low %v2750_v12, %v3385_v13  ;;  %v660_v2 = vrot.slane %v658_v20, 1  ;;  %v1853_v33 = vsel %vm802_vm0, %v1851_v63, %v1852_v7  ;;  %v3486_v13 = vld [vmem:[%s3245_s19 + $0x2c] ss:$0 sps:$4 sm:$0x11]   ;;  %v252_v63 = vld [vmem:[%s3245_s19 + $0x24] sm:$0xe] }
  0x3a   : > { %v560_v17 = vor.u32 %v559_v28, %v555_v26  ;;  %v564_v41 = vrot.slane %v562_v27, 1  ;;  %v1855_v43 = vrot.slane %v3408_v11, 1  ;;  %v1831_v45 = vrot.slane %v3412_v34, 1  ;;  %v251_v34 = vld [vmem:[%s3245_s19 + $0x18] sm:$0xe] }
  0x3b   : > { %1381 = vrot.lane.b32.xlu1 %v1344_v22, %s3197_s24  ;;  %v651_v22 = vshrl.u32 %v3430_v50, 16  ;;  %4554 = vst [vmem:[#allocation2_spill] sm:$0xff] %v3473_v29  ;;  %v1854_v42 = vrot.slane %v2894_v30, 1  ;;  %v670_v49 = vshll.u32 %v3481_v36, 16  ;;  %v567_v1 = vshrl.u32 %v3473_v29, 16 }
  0x3c   : > { %1365 = vrot.lane.b32.xlu0 %v1320_v25, %s3197_s24  ;;  %v3468_v25 = vcombine.low %v223_v6, %v3451_v57  ;;  %v2791_v61 = vcombine.low %v251_v34, %v3421_v40  ;;  %v834_v7 = vrot.slane %v3439_v4, 1  ;;  %v810_v9 = vrot.slane %v3445_v56, 1  ;;  %v2633_v56 = vld [vmem:[%s3245_s19 + $0x24] sm:$0xf]  ;;  %v2651_v28 = vld [vmem:[%s3245_s19 + $0x90] sm:$0xf] }
  0x3d   : > { %v1856_v55 = vsel %vm802_vm0, %v1854_v42, %v1855_v43  ;;  %v2792_v4 = vcombine.low %v252_v63, %v3456_v10  ;;  %v3533_v10 = vld [vmem:[%s3245_s19 + $0x94] sm:$0xf] }
  0x3e   : > { %v665_v37 = vshll.u32 %v3468_v25, 16  ;;  %v663_v47 = vshrl.u32 %v3468_v25, 16 }
  0x3f   : > { %1491 = vrot.lane.b32.xlu1 %v2861_v0, %s3198_s25  ;;  %v1566_v0 = vsel %vm529_vm1, %v1561_v51, %v1565_v52  ;;  %v259_v51 = vld [vmem:[%s3245_s19 + $0x78] sm:$0xe]  ;;  %v565_v52 = vsel %vm529_vm1, %v560_v17, %v564_v41  ;;  %v812_v30 = vrot.slane %v2792_v4, 1  ;;  %v3547_v41 = vld [vmem:[%s3245_s19 + $0x8c] ss:$0 sps:$4 sm:$0x11]  }
  0x40   : > { %1475 = vrot.lane.b32.xlu0 %v2853_v15, %s3198_s25  ;;  %v1827_v15 = vrot.slane %v2885_v54, 1  ;;  %v667_v48 = vrot.slane %v665_v37, 1  ;;  %v574_v54 = vshll.u32 %v3486_v13, 16  ;;  %v2799_v60 = vcombine.low %v259_v51, %v3417_v39  ;;  %v2680_v4 = vld [vmem:[%s3245_s19 + $0x30] sm:$0xe] }
  0x42   : > { %v1829_v5 = vsel %vm802_vm0, %v1827_v15, %v1828_v16  ;;  %v668_v58 = vor.u32 %v667_v48, %v663_v47  ;;  %v576_v6 = vrot.slane %v574_v54, 1  ;;  %v833_v40 = vrot.slane %v2799_v60, 1  ;;  %v2649_v15 = vld [vmem:[%s3245_s19 + $0x84] sm:$0xf]  ;;  %v3517_v16 = vld [vmem:[%s3245_s19 + $0x88] sm:$0xf] }
  0x43   : > { %1493 = vrot.lane.b32.xlu1 %v2862_v8, %s3198_s25  ;;  %v2742_v8 = vld [vmem:[%s3245_s19 + $0x24] sm:$0xe]  ;;  %v1171_v47 = vshll.u32 %v3547_v41, 16 }
  0x44   : > { %1477 = vrot.lane.b32.xlu0 %v2854_v24, %s3198_s25  ;;  %v655_v24 = vrot.slane %v653_v62, 1  ;;  %v2886_v32 = vcombine.low %v2742_v8, %v3391_v19  ;;  %v569_v19 = vshll.u32 %v3473_v29, 16  ;;  %v260_v62 = vld [vmem:[%s3245_s19 + $0x84] sm:$0xe]  ;;  %v3523_v8 = vld [vmem:[%s3245_s19 + $0x28] sm:$0xf] }
  0x45   : > { %v2800_v12 = vcombine.low %v260_v62, %v3451_v57  ;;  %v2807_v26 = vcombine.low %v2633_v56, %v3523_v8  ;;  %v1173_v54 = vrot.slane %v1171_v47, 1  ;;  %v3118_v47 = vld [vmem:[%s4546_s1 + $0x10] ss:$0 sps:$4 sm:$0x33]   ;;  %v213_v29 = vld [vmem:[%s3245_s19 + $0x48] sm:$0xf] }
  0x46   : > { %v656_v35 = vor.u32 %v655_v24, %v651_v22  ;;  %v1830_v44 = vrot.slane %v2886_v32, 1  ;;  %v571_v11 = vrot.slane %v569_v19, 1  ;;  %v2815_v22 = vcombine.low %v2649_v15, %v3517_v16  ;;  %v3551_v19 = vld [vmem:[%s3245_s19 + $0x2c] ss:$0 sps:$4 sm:$0x11]   ;;  %2987 = vmatprep.subr.msk.bf16.mxu0 %vm2231_vm2, %v3118_v47  ;;  %2988 = vmatprep.subr.msk.bf16.mxu1 %vm2231_vm2, %v3118_v47 }
  0x47   : > { %1763 = vrot.lane.b32.xlu1 %v1662_v59, %s3199_s26  ;;  %v672_v59 = vrot.slane %v670_v49, 1  ;;  %v836_v57 = vrot.slane %v2800_v12, 1  ;;  %v835_v24 = vsel %vm802_vm0, %v833_v40, %v834_v7  ;;  %v813_v32 = vrot.slane %v3486_v13, 1  ;;  %v3557_v49 = vld [vmem:[%s3245_s19 + $0x98] ss:$0 sps:$4 sm:$0x11]  }
  0x48   : > { %1747 = vrot.lane.b32.xlu0 %v1566_v0, %s3199_s26  ;;  %v661_v46 = vsel %vm529_vm1, %v656_v35, %v660_v2  ;;  %v1832_v0 = vsel %vm802_vm0, %v1830_v44, %v1831_v45  ;;  %v572_v3 = vor.u32 %v571_v11, %v567_v1  ;;  %v2635_v2 = vld [vmem:[%s3245_s19 + $0x30] sm:$0xf]  ;;  %v1166_v35 = vshll.u32 %v2815_v22, 16 }
  0x49   : > { %v673_v39 = vsel %vm529_vm1, %v668_v58, %v672_v59  ;;  %v814_v13 = vsel %vm802_vm0, %v812_v30, %v813_v32  ;;  %v1164_v43 = vshrl.u32 %v2815_v22, 16  ;;  %v1068_v45 = vshrl.u32 %v2807_v26, 16  ;;  %v2687_v59 = vld [vmem:[%s3245_s19 + $0x84] sm:$0xe]  ;;  %v2697_v30 = vld [vmem:[%s3245_s19 + $0x30] sm:$0xf] }
  0x4a   : > { %v577_v20 = vsel %vm529_vm1, %v572_v3, %v576_v6  ;;  %v1168_v44 = vrot.slane %v1166_v35, 1  ;;  %v1075_v51 = vshll.u32 %v3551_v19, 16  ;;  %v1183_v58 = vshll.u32 %v3557_v49, 16  ;;  %v2679_v3 = vld [vmem:[%s3245_s19 + $0x24] sm:$0xe] }
  0x4b   : > { %1765 = vrot.lane.b32.xlu1 %v1674_v14, %s3199_s26  ;;  %v809_v14 = vrot.slane %v2791_v61, 1  ;;  %v2688_v6 = vld [vmem:[%s3245_s19 + $0x90] sm:$0xe]  ;;  %v2847_v63 = vcombine.low %v2687_v59, %v3517_v16  ;;  %v3592_v32 = vld [vmem:[%s3245_s19 + $0x34] sm:$0xf] }
  0x4c   : > { %1749 = vrot.lane.b32.xlu0 %v1578_v21, %s3199_s26  ;;  %v837_v21 = vrot.slane %v3481_v36, 1  ;;  %v2816_v36 = vcombine.low %v2651_v28, %v3533_v10  ;;  %v1169_v1 = vor.u32 %v1168_v44, %v1164_v43  ;;  %v1077_v60 = vrot.slane %v1075_v51, 1  ;;  %v2715_v35 = vld [vmem:[%s3245_s19 + $0x9c] sm:$0xf] }
  0x4d   : > { %v811_v27 = vsel %vm802_vm0, %v809_v14, %v810_v9  ;;  %v1185_v12 = vrot.slane %v1183_v58, 1  ;;  %v1345_v56 = vrot.slane %v2847_v63, 1  ;;  %v1322_v28 = vrot.slane %v3551_v19, 1  ;;  %v3622_v51 = vld [vmem:[%s3245_s19 + $0x38] ss:$0 sps:$4 sm:$0x11]  }
  0x4e   : > { %v838_v37 = vsel %vm802_vm0, %v836_v57, %v837_v21  ;;  %v1178_v42 = vshll.u32 %v2816_v36, 16  ;;  %v1176_v11 = vshrl.u32 %v2816_v36, 16  ;;  %v1174_v7 = vsel %vm529_vm1, %v1169_v1, %v1173_v54  ;;  %v2713_v57 = vld [vmem:[%s3245_s19 + $0x90] sm:$0xf]  ;;  %v3584_v21 = vld [vmem:[%s3245_s19 + $0x94] sm:$0xf] }
  0x4f   : > { %1891 = vrot.lane.b32.xlu1 %v1853_v33, %s3200_s27  ;;  %v3539_v33 = vld [vmem:[%s3245_s19 + $0x34] sm:$0xf]  ;;  %v2855_v19 = vcombine.low %v2697_v30, %v3592_v32  ;;  %v3625_v1 = vld [vmem:[%s3245_s19 + $0xa4] ss:$0 sps:$4 sm:$0x11]  }
  0x50   : > { %1875 = vrot.lane.b32.xlu0 %v1829_v5, %s3200_s27  ;;  %v1070_v5 = vshll.u32 %v2807_v26, 16  ;;  %v2808_v17 = vcombine.low %v2635_v2, %v3539_v33  ;;  %v2863_v2 = vcombine.low %v2713_v57, %v3584_v21  ;;  %v225_v63 = vld [vmem:[%s3245_s19 + $0x90] sm:$0xf] }
  0x52   : > { %v1072_v48 = vrot.slane %v1070_v5, 1  ;;  %v1080_v61 = vshrl.u32 %v2808_v17, 16  ;;  %v3604_v5 = vld [vmem:[%s3245_s19 + $0x40] sm:$0xf]  ;;  %v1678_v43 = vshll.u32 %v2863_v2, 16 }
  0x53   : > { %742 = vrot.lane.b32.xlu1 %v661_v46, %s3195_s22  ;;  %v1082_v46 = vshll.u32 %v2808_v17, 16 }
  0x54   : > { %726 = vrot.lane.b32.xlu0 %v565_v52, %s3195_s22  ;;  %v3561_v52 = vld [vmem:[%s3245_s19 + $0x38] ss:$0 sps:$4 sm:$0x11]   ;;  %v1073_v34 = vor.u32 %v1072_v48, %v1068_v45  ;;  %v1680_v58 = vrot.slane %v1678_v43, 1 }
  0x55   : > { %v1084_v62 = vrot.slane %v1082_v46, 1  ;;  %v3615_v46 = vld [vmem:[%s3245_s19 + $0x98] ss:$0 sps:$4 sm:$0x11]  }
  0x56   : > { %v1078_v40 = vsel %vm529_vm1, %v1073_v34, %v1077_v60  ;;  %v1676_v34 = vshrl.u32 %v2863_v2, 16  ;;  %v1683_v59 = vshll.u32 %v3615_v46, 16  ;;  %v1580_v60 = vshrl.u32 %v2855_v19, 16 }
  0x57   : > { %1893 = vrot.lane.b32.xlu1 %v1856_v55, %s3200_s27  ;;  %v1180_v55 = vrot.slane %v1178_v42, 1  ;;  %v1085_v14 = vor.u32 %v1084_v62, %v1080_v61  ;;  %v2233_v61 = vsel %vm2231_vm2, %v3118_v47, 0  ;;  %v3128_v62 = vld [vmem:[%s4546_s1] sm:$0xff]  }
  0x58   : > { %1877 = vrot.lane.b32.xlu0 %v1832_v0, %s3200_s27  ;;  %v1087_v0 = vshll.u32 %v3561_v52, 16  ;;  %2944 = vmatpush3.bf16.msra.mxu0 %v2233_v61  ;;  %v3683_v47 = vld [vmem:[%s3245_s19 + $0x40] sm:$0xf] }
  0x59   : > { %v1181_v9 = vor.u32 %v1180_v55, %v1176_v11  ;;  %v3123_v11 = vld [vmem:[%s4546_s1 + $0x8] sm:$0xff]   ;;  %v3632_v55 = vld [vmem:[%s3245_s19 + $0x44] ss:$0 sps:$4 sm:$0x11]   ;;  %2984 = vmatpush3.bf16.msra.mxu1 %v2233_v61 }
  0x5a   : > { %v1089_v15 = vrot.slane %v1087_v0, 1  ;;  %v2751_v0 = vld [vmem:[%s3245_s19 + $0x90] sm:$0xe]  ;;  %2945 = vmatprep.subr.bf16.mxu0 %v3123_v11  ;;  %2982 = vmatprep.subr.bf16.mxu1 %v3123_v11 }
  0x5b   : > { %744 = vrot.lane.b32.xlu1 %v673_v39, %s3195_s22  ;;  %v2839_v39 = vcombine.low %v2679_v3, %v3523_v8  ;;  %v1186_v16 = vsel %vm529_vm1, %v1181_v9, %v1185_v12  ;;  %v1346_v8 = vrot.slane %v3547_v41, 1  ;;  %v1695_v12 = vshll.u32 %v3625_v1, 16 }
  0x5c   : > { %728 = vrot.lane.b32.xlu0 %v577_v20, %s3195_s22  ;;  %v2848_v20 = vcombine.low %v2688_v6, %v3533_v10  ;;  %v1587_v6 = vshll.u32 %v3622_v51, 16  ;;  %2946 = vmatpush3.bf16.msra.mxu0 %v3123_v11 }
  0x5d   : > { %2985 = vmatpush3.bf16.msra.mxu1 %v3123_v11  ;;  %2947 = vmatprep.subr.bf16.mxu0 %v3128_v62 }
  0x5e   : > { %v1348_v10 = vrot.slane %v2848_v20, 1  ;;  %2983 = vmatprep.subr.bf16.mxu1 %v3128_v62 }
  0x5f   : > { %871 = vrot.lane.b32.xlu1 %v835_v24, %s3194_s21  ;;  %v1090_v24 = vsel %vm529_vm1, %v1085_v14, %v1089_v15 }
  0x60   : > { %855 = vrot.lane.b32.xlu0 %v811_v27, %s3194_s21  ;;  %v1349_v27 = vrot.slane %v3557_v49, 1  ;;  %v1582_v49 = vshll.u32 %v2855_v19, 16  ;;  %2948 = vmatpush3.bf16.msra.mxu0 %v3128_v62 }
  0x61   : > { %2986 = vmatpush3.bf16.msra.mxu1 %v3128_v62 }
  0x62   : > { %v1350_v45 = vsel %vm802_vm0, %v1348_v10, %v1349_v27  ;;  %v1584_v3 = vrot.slane %v1582_v49, 1  ;;  %v1697_v10 = vrot.slane %v1695_v12, 1  ;;  %v3710_v12 = vld [vmem:[%s3245_s19 + $0xa4] ss:$0 sps:$4 sm:$0x11]  }
  0x63   : > { %873 = vrot.lane.b32.xlu1 %v838_v37, %s3194_s21  ;;  %v2699_v37 = vld [vmem:[%s3245_s19 + $0x3c] sm:$0xf] }
  0x64   : > { %857 = vrot.lane.b32.xlu0 %v814_v13, %s3194_s21  ;;  %v1325_v13 = vrot.slane %v3561_v52, 1  ;;  %v2856_v44 = vcombine.low %v2699_v37, %v3604_v5 }
  0x66   : > { %v1594_v54 = vshll.u32 %v2856_v44, 16  ;;  %v1592_v15 = vshrl.u32 %v2856_v44, 16 }
  0x67   : > { %983 = vrot.lane.b32.xlu1 %v2815_v22, %s3193_s20  ;;  %v2840_v22 = vcombine.low %v2680_v4, %v3539_v33  ;;  %v1347_v33 = vsel %vm802_vm0, %v1345_v56, %v1346_v8  ;;  %v1599_v4 = vshll.u32 %v3632_v55, 16  ;;  %v1681_v56 = vor.u32 %v1680_v58, %v1676_v34  ;;  %v2744_v58 = vld [vmem:[%s3245_s19 + $0x3c] sm:$0xe] }
  0x68   : > { %967 = vrot.lane.b32.xlu0 %v2807_v26, %s3193_s20  ;;  %v1321_v26 = vrot.slane %v2839_v39, 1  ;;  %v209_v39 = vld [vmem:[%s3245_s19 + $0x30] sm:$0xf]  ;;  %v1596_v20 = vrot.slane %v1594_v54, 1  ;;  %v1685_v8 = vrot.slane %v1683_v59, 1  ;;  %v1834_v34 = vrot.slane %v3622_v51, 1 }
  0x69   : > { %v1324_v41 = vrot.slane %v2840_v22, 1  ;;  %v1585_v22 = vor.u32 %v1584_v3, %v1580_v60 }
  0x6b   : > { %985 = vrot.lane.b32.xlu1 %v2816_v36, %s3193_s20  ;;  %v3598_v36 = vld [vmem:[%s3245_s19 + $0xa0] sm:$0xf]  ;;  %v1326_v48 = vsel %vm802_vm0, %v1324_v41, %v1325_v13 }
  0x6c   : > { %969 = vrot.lane.b32.xlu0 %v2808_v17, %s3193_s20  ;;  %v1323_v17 = vsel %vm802_vm0, %v1321_v26, %v1322_v28  ;;  %v2864_v42 = vcombine.low %v2715_v35, %v3598_v36  ;;  %v2895_v28 = vcombine.low %v2751_v0, %v3584_v21  ;;  %v1601_v35 = vrot.slane %v1599_v4, 1 }
  0x6d   : > { %v1686_v21 = vsel %vm529_vm1, %v1681_v56, %v1685_v8  ;;  %v3719_v56 = vld [vmem:[%s3245_s19 + $0x44] ss:$0 sps:$4 sm:$0x11]  }
  0x6e   : > { %v1690_v52 = vshll.u32 %v2864_v42, 16  ;;  %v1688_v9 = vshrl.u32 %v2864_v42, 16  ;;  %v1857_v43 = vrot.slane %v2895_v28, 1  ;;  %v1861_v28 = vrot.slane %v3625_v1, 1 }
  0x6f   : > { %1255 = vrot.lane.b32.xlu1 %v1174_v7, %s3196_s23  ;;  %v3643_v7 = vld [vmem:[%s3245_s19 + $0x94] sm:$0xf] }
  0x70   : > { %1239 = vrot.lane.b32.xlu0 %v1078_v40, %s3196_s23  ;;  %v3648_v40 = vld [vmem:[%s3245_s19 + $0x34] sm:$0xf]  ;;  %v1692_v14 = vrot.slane %v1690_v52, 1  ;;  %v3655_v57 = vcombine.low %v225_v63, %v3643_v7 }
  0x71   : > { %v3658_v26 = vcombine.low %v209_v39, %v3648_v40 }
  0x72   : > { %4555 = vst [vmem:[#allocation3_spill] sm:$0xff] %v3655_v57  ;;  %v1693_v30 = vor.u32 %v1692_v14, %v1688_v9  ;;  %v677_v37 = vshll.u32 %v3655_v57, 16  ;;  %v2888_v9 = vcombine.low %v2744_v58, %v3604_v5 }
  0x73   : > { %1257 = vrot.lane.b32.xlu1 %v1186_v16, %s3196_s23  ;;  %v2743_v16 = vld [vmem:[%s3245_s19 + $0x30] sm:$0xe]  ;;  %4556 = vst [vmem:[#allocation4_spill] sm:$0xff] %v3658_v26  ;;  %v581_v13 = vshll.u32 %v3658_v26, 16  ;;  %v579_v62 = vshrl.u32 %v3658_v26, 16 }
  0x74   : > { %1241 = vrot.lane.b32.xlu0 %v1090_v24, %s3196_s23  ;;  %v1589_v24 = vrot.slane %v1587_v6, 1  ;;  %v2887_v27 = vcombine.low %v2743_v16, %v3592_v32  ;;  %v1698_v52 = vsel %vm529_vm1, %v1693_v30, %v1697_v10  ;;  %v679_v59 = vrot.slane %v677_v37, 1  ;;  %v261_v37 = vld [vmem:[%s3245_s19 + $0x90] sm:$0xe] }
  0x75   : > { %v583_v0 = vrot.slane %v581_v13, 1  ;;  %v1836_v10 = vrot.slane %v2888_v9, 1  ;;  %v694_v30 = vshll.u32 %v3710_v12, 16 }
  0x76   : > { %v1590_v32 = vsel %vm529_vm1, %v1585_v22, %v1589_v24  ;;  %v1833_v54 = vrot.slane %v2887_v27, 1  ;;  %v1837_v27 = vrot.slane %v3632_v55, 1 }
  0x77   : > { %1383 = vrot.lane.b32.xlu1 %v1347_v33, %s3197_s24  ;;  %v3664_v33 = vld [vmem:[%s3245_s19 + $0x98] ss:$0 sps:$4 sm:$0x11]   ;;  %v584_v16 = vor.u32 %v583_v0, %v579_v62  ;;  %v254_v62 = vld [vmem:[%s3245_s19 + $0x3c] sm:$0xe] }
  0x78   : > { %1367 = vrot.lane.b32.xlu0 %v1323_v17, %s3197_s24  ;;  %v3670_v17 = vld [vmem:[%s3245_s19 + $0x38] ss:$0 sps:$4 sm:$0x11]   ;;  %v682_v60 = vshll.u32 %v3664_v33, 16 }
  0x79   : > { %v586_v3 = vshll.u32 %v3670_v17, 16 }
  0x7b   : > { %1385 = vrot.lane.b32.xlu1 %v1350_v45, %s3197_s24  ;;  %v211_v45 = vld [vmem:[%s3245_s19 + $0x3c] sm:$0xf]  ;;  %v588_v5 = vrot.slane %v586_v3, 1 }
  0x7c   : > { %1369 = vrot.lane.b32.xlu0 %v1326_v48, %s3197_s24  ;;  %v2752_v48 = vld [vmem:[%s3245_s19 + $0x9c] sm:$0xe]  ;;  %v3702_v6 = vcombine.low %v211_v45, %v3683_v47 }
  0x7d   : > { %v2896_v51 = vcombine.low %v2752_v48, %v3598_v36  ;;  %v1835_v36 = vsel %vm802_vm0, %v1833_v54, %v1834_v34  ;;  %v589_v13 = vsel %vm529_vm1, %v584_v16, %v588_v5  ;;  %v1838_v34 = vsel %vm802_vm0, %v1836_v10, %v1837_v27  ;;  %v2639_v27 = vld [vmem:[%s3245_s19 + $0x48] sm:$0xf] }
  0x7e   : > { %4558 = vst [vmem:[#allocation6_spill] sm:$0xff] %v3702_v6  ;;  %v593_v8 = vshll.u32 %v3702_v6, 16  ;;  %v843_v10 = vrot.slane %v3710_v12, 1 }
  0x7f   : > { %1495 = vrot.lane.b32.xlu1 %v2863_v2, %s3198_s25  ;;  %v1597_v2 = vor.u32 %v1596_v20, %v1592_v15  ;;  %v684_v15 = vrot.slane %v682_v60, 1  ;;  %v1860_v22 = vrot.slane %v2896_v51, 1  ;;  %v2653_v51 = vld [vmem:[%s3245_s19 + $0x9c] sm:$0xf] }
  0x80   : > { %1479 = vrot.lane.b32.xlu0 %v2855_v19, %s3198_s25  ;;  %v227_v19 = vld [vmem:[%s3245_s19 + $0x9c] sm:$0xf]  ;;  %v595_v1 = vrot.slane %v593_v8, 1  ;;  %v3774_v8 = vld [vmem:[%s3245_s19 + $0xac] sm:$0xf] }
  0x81   : > { %v1602_v11 = vsel %vm529_vm1, %v1597_v2, %v1601_v35  ;;  %v1862_v48 = vsel %vm802_vm0, %v1860_v22, %v1861_v28 }
  0x83   : > { %1497 = vrot.lane.b32.xlu1 %v2864_v42, %s3198_s25  ;;  %v3678_v42 = vld [vmem:[%s3245_s19 + $0xa0] sm:$0xf] }
  0x84   : > { %1481 = vrot.lane.b32.xlu0 %v2856_v44, %s3198_s25  ;;  %v1858_v44 = vrot.slane %v3615_v46, 1  ;;  %v675_v46 = vshrl.u32 %v3655_v57, 16  ;;  %v3697_v61 = vcombine.low %v227_v19, %v3678_v42  ;;  %v591_v19 = vshrl.u32 %v3702_v6, 16 }
  0x86   : > { %4557 = vst [vmem:[#allocation5_spill] sm:$0xff] %v3697_v61  ;;  %v1859_v39 = vsel %vm802_vm0, %v1857_v43, %v1858_v44  ;;  %v680_v14 = vor.u32 %v679_v59, %v675_v46  ;;  %v689_v20 = vshll.u32 %v3697_v61, 16  ;;  %v687_v35 = vshrl.u32 %v3697_v61, 16  ;;  %v262_v59 = vld [vmem:[%s3245_s19 + $0x9c] sm:$0xe] }
  0x87   : > { %v3673_v41 = vpop.permute.xlu1 %979  ;;  %1767 = vrot.lane.b32.xlu1 %v1686_v21, %s3199_s26  ;;  %v598_v43 = vshll.u32 %v3719_v56, 16  ;;  %v2801_v44 = vcombine.low %v261_v37, %v3643_v7  ;;  %v596_v58 = vor.u32 %v595_v1, %v591_v19  ;;  %v840_v7 = vrot.slane %v3664_v33, 1  ;;  %v2637_v33 = vld [vmem:[%s3245_s19 + $0x3c] sm:$0xf] }
  0x88   : > { %v3687_v49 = vpop.permute.xlu0 %963  ;;  %1751 = vrot.lane.b32.xlu0 %v1590_v32, %s3199_s26  ;;  %v685_v2 = vsel %vm529_vm1, %v680_v14, %v684_v15  ;;  %v691_v21 = vrot.slane %v689_v20, 1  ;;  %v253_v32 = vld [vmem:[%s3245_s19 + $0x30] sm:$0xe]  ;;  %v3758_v14 = vld [vmem:[%s3245_s19 + $0xa0] sm:$0xf]  ;;  %v2794_v20 = vcombine.low %v254_v62, %v3683_v47  ;;  %v819_v37 = vrot.slane %v3719_v56, 1 }
  0x89   : > { %v2793_v45 = vcombine.low %v253_v32, %v3648_v40  ;;  %v600_v46 = vrot.slane %v598_v43, 1  ;;  %v816_v40 = vrot.slane %v3670_v17, 1  ;;  %v839_v0 = vrot.slane %v2801_v44, 1  ;;  %v3794_v1 = vld [vmem:[%s3245_s19 + $0xa4] ss:$0 sps:$4 sm:$0x11]  }
  0x8a   : > { %v2817_v5 = vcombine.low %v2653_v51, %v3758_v14  ;;  %v3810_v62 = vld [vmem:[%s3245_s19 + $0xb0] ss:$0 sps:$4 sm:$0x11]  }
  0x8b   : > { %v3705_v63 = vpop.permute.xlu1 %867  ;;  %1769 = vrot.lane.b32.xlu1 %v1698_v52, %s3199_s26  ;;  %v692_v52 = vor.u32 %v691_v21, %v687_v35  ;;  %v815_v3 = vrot.slane %v2793_v45, 1  ;;  %v601_v15 = vsel %vm529_vm1, %v596_v58, %v600_v46  ;;  %v841_v22 = vsel %vm802_vm0, %v839_v0, %v840_v7  ;;  %v3816_v51 = vld [vmem:[%s3245_s19 + $0x50] ss:$0 sps:$4 sm:$0x11]  }
  0x8c   : > { %1753 = vrot.lane.b32.xlu0 %v1602_v11, %s3199_s26  ;;  %v696_v11 = vrot.slane %v694_v30, 1  ;;  %v3782_v30 = vld [vmem:[%s3245_s19 + $0x4c] sm:$0xf]  ;;  %v818_v21 = vrot.slane %v2794_v20, 1  ;;  %v1190_v12 = vshll.u32 %v2817_v5, 16 }
  0x8d   : > { %v3715_v4 = vpop.permute.xlu0 %851  ;;  %v817_v35 = vsel %vm802_vm0, %v815_v3, %v816_v40  ;;  %v2810_v19 = vcombine.low %v2639_v27, %v3782_v30 }
  0x8e   : > { %v697_v9 = vsel %vm529_vm1, %v692_v52, %v696_v11  ;;  %v820_v56 = vsel %vm802_vm0, %v818_v21, %v819_v37  ;;  %v1192_v46 = vrot.slane %v1190_v12, 1  ;;  %v1111_v37 = vshll.u32 %v3816_v51, 16 }
  0x8f   : > { %1895 = vrot.lane.b32.xlu1 %v1859_v39, %s3200_s27  ;;  %v2802_v39 = vcombine.low %v262_v59, %v3678_v42  ;;  %v2655_v42 = vld [vmem:[%s3245_s19 + $0xa8] sm:$0xf]  ;;  %v1106_v58 = vshll.u32 %v2810_v19, 16  ;;  %v1195_v59 = vshll.u32 %v3794_v1, 16  ;;  %v1104_v21 = vshrl.u32 %v2810_v19, 16 }
  0x90   : > { %v3723_v24 = vpop.permute.xlu1 %869  ;;  %1879 = vrot.lane.b32.xlu0 %v1835_v36, %s3200_s27  ;;  %v3766_v36 = vld [vmem:[%s3245_s19 + $0x40] sm:$0xf] }
  0x91   : > { %v842_v28 = vrot.slane %v2802_v39, 1  ;;  %v2809_v47 = vcombine.low %v2637_v33, %v3766_v36  ;;  %v1197_v20 = vrot.slane %v1195_v59, 1  ;;  %v2682_v59 = vld [vmem:[%s3245_s19 + $0x48] sm:$0xe] }
  0x92   : > { %v3736_v55 = vpop.permute.xlu0 %853 }
  0x93   : > { %746 = vrot.lane.b32.xlu1 %v685_v2, %s3195_s22  ;;  %v844_v43 = vsel %vm802_vm0, %v842_v28, %v843_v10  ;;  %v1094_v44 = vshll.u32 %v2809_v47, 16  ;;  %v1092_v7 = vshrl.u32 %v2809_v47, 16  ;;  %v1207_v28 = vshll.u32 %v3810_v62, 16  ;;  %v2681_v10 = vld [vmem:[%s3245_s19 + $0x3c] sm:$0xe] }
  0x94   : > { %730 = vrot.lane.b32.xlu0 %v589_v13, %s3195_s22  ;;  %v2818_v13 = vcombine.low %v2655_v42, %v3774_v8 }
  0x95   : > { %v3743_v54 = vpop.permute.xlu1 %724  ;;  %v1096_v40 = vrot.slane %v1094_v44, 1  ;;  %v3834_v44 = vld [vmem:[%s3245_s19 + $0xac] sm:$0xf] }
  0x96   : > { %v3747_v60 = vpop.permute.xlu0 %722  ;;  %v1202_v11 = vshll.u32 %v2818_v13, 16  ;;  %v1200_v33 = vshrl.u32 %v2818_v13, 16 }
  0x97   : > { %1897 = vrot.lane.b32.xlu1 %v1862_v48, %s3200_s27  ;;  %v3802_v48 = vld [vmem:[%s3245_s19 + $0x44] ss:$0 sps:$4 sm:$0x11]   ;;  %v1097_v42 = vor.u32 %v1096_v40, %v1092_v7  ;;  %v1113_v40 = vrot.slane %v1111_v37, 1 }
  0x98   : > { %1881 = vrot.lane.b32.xlu0 %v1838_v34, %s3200_s27  ;;  %v1188_v34 = vshrl.u32 %v2817_v5, 16  ;;  %v1099_v3 = vshll.u32 %v3802_v48, 16  ;;  %v1328_v37 = vrot.slane %v3802_v48, 1 }
  0x99   : > { %v3761_v17 = vpop.permute.xlu1 %740 }
  0x9a   : > { %v3768_v16 = vpop.permute.xlu0 %738  ;;  %v1193_v39 = vor.u32 %v1192_v46, %v1188_v34  ;;  %v1209_v46 = vrot.slane %v1207_v28, 1 }
  0x9b   : > { %748 = vrot.lane.b32.xlu1 %v697_v9, %s3195_s22 }
  0x9c   : > { %732 = vrot.lane.b32.xlu0 %v601_v15, %s3195_s22  ;;  %v2689_v15 = vld [vmem:[%s3245_s19 + $0x9c] sm:$0xe]  ;;  %v1198_v34 = vsel %vm529_vm1, %v1193_v39, %v1197_v20  ;;  %v3855_v39 = vld [vmem:[%s3245_s19 + $0xb8] sm:$0xf] }
  0x9d   : > { %v3784_v2 = vpop.permute.xlu1 %981 }
  0x9e   : > { %v3788_v32 = vpop.permute.xlu0 %965 }
  0x9f   : > { %875 = vrot.lane.b32.xlu1 %v841_v22, %s3194_s21  ;;  %v1204_v22 = vrot.slane %v1202_v11, 1  ;;  %v2690_v11 = vld [vmem:[%s3245_s19 + $0xa8] sm:$0xe] }
  0xa0   : > { %859 = vrot.lane.b32.xlu0 %v817_v35, %s3194_s21  ;;  %v1101_v35 = vrot.slane %v1099_v3, 1  ;;  %v2701_v3 = vld [vmem:[%s3245_s19 + $0x48] sm:$0xf] }
  0xa1   : > { %v3798_v45 = vpop.permute.xlu1 %1251 }
  0xa2   : > { %v3804_v52 = vpop.permute.xlu0 %1235 }
  0xa3   : > { %877 = vrot.lane.b32.xlu1 %v844_v43, %s3194_s21  ;;  %v2717_v43 = vld [vmem:[%s3245_s19 + $0xa8] sm:$0xf] }
  0xa4   : > { %861 = vrot.lane.b32.xlu0 %v820_v56, %s3194_s21  ;;  %v2841_v56 = vcombine.low %v2681_v10, %v3766_v36  ;;  %v3848_v36 = vcombine.low %v2717_v43, %v3834_v44  ;;  %v3851_v10 = vld [vmem:[%s3245_s19 + $0x4c] sm:$0xf] }
  0xa5   : > { %v3812_v0 = vpop.permute.xlu1 %1253 }
  0xa6   : > { %v3818_v9 = vpop.permute.xlu0 %1237 }
  0xa7   : > { %987 = vrot.lane.b32.xlu1 %v2817_v5, %s3193_s20  ;;  %v1108_v5 = vrot.slane %v1106_v58, 1  ;;  %v1205_v58 = vor.u32 %v1204_v22, %v1200_v33  ;;  %v2850_v33 = vcombine.low %v2690_v11, %v3774_v8  ;;  %v2842_v22 = vcombine.low %v2682_v59, %v3782_v30  ;;  %v3875_v30 = vld [vmem:[%s3245_s19 + $0x58] sm:$0xf]  ;;  %v3881_v11 = vld [vmem:[%s3245_s19 + $0xb0] ss:$0 sps:$4 sm:$0x11]  }
  0xa8   : > { %971 = vrot.lane.b32.xlu0 %v2809_v47, %s3193_s20  ;;  %v2849_v47 = vcombine.low %v2689_v15, %v3758_v14  ;;  %v1102_v14 = vsel %vm529_vm1, %v1097_v42, %v1101_v35  ;;  %v1352_v42 = vrot.slane %v3794_v1, 1  ;;  %v1327_v35 = vrot.slane %v2841_v56, 1  ;;  %v2703_v1 = vld [vmem:[%s3245_s19 + $0x54] sm:$0xf] }
  0xa9   : > { %v3825_v27 = vpop.permute.xlu1 %1379  ;;  %v1210_v28 = vsel %vm529_vm1, %v1205_v58, %v1209_v46  ;;  %v3868_v8 = vcombine.low %v2701_v3, %v3851_v10  ;;  %v1702_v56 = vshll.u32 %v3848_v36, 16  ;;  %v1355_v58 = vrot.slane %v3810_v62, 1 }
  0xaa   : > { %v3828_v12 = vpop.permute.xlu0 %1363  ;;  %v1351_v20 = vrot.slane %v2849_v47, 1  ;;  %v1330_v46 = vrot.slane %v2842_v22, 1  ;;  %v1331_v59 = vrot.slane %v3816_v51, 1  ;;  %v1329_v3 = vsel %vm802_vm0, %v1327_v35, %v1328_v37  ;;  %v3907_v35 = vld [vmem:[%s3245_s19 + $0x50] ss:$0 sps:$4 sm:$0x11]  }
  0xab   : > { %989 = vrot.lane.b32.xlu1 %v2818_v13, %s3193_s20  ;;  %v1109_v13 = vor.u32 %v1108_v5, %v1104_v21  ;;  %v1700_v51 = vshrl.u32 %v3848_v36, 16  ;;  %v1925_v22 = vsel %vm1907_vm3, %v3277_v18, %v3768_v16  ;;  %v3917_v16 = vld [vmem:[%s3245_s19 + $0xbc] ss:$0 sps:$4 sm:$0x11]  }
  0xac   : > { %973 = vrot.lane.b32.xlu0 %v2810_v19, %s3193_s20  ;;  %v2719_v19 = vld [vmem:[%s3245_s19 + $0xb4] sm:$0xf]  ;;  %v1353_v48 = vsel %vm802_vm0, %v1351_v20, %v1352_v42  ;;  %v1704_v20 = vrot.slane %v1702_v56, 1  ;;  %v1707_v42 = vshll.u32 %v3881_v11, 16 }
  0xad   : > { %v3841_v7 = vpop.permute.xlu1 %1381  ;;  %v1114_v5 = vsel %vm529_vm1, %v1109_v13, %v1113_v40  ;;  %v3871_v47 = vcombine.low %v2719_v19, %v3855_v39  ;;  %v3890_v13 = vcombine.low %v2703_v1, %v3875_v30  ;;  %v1606_v19 = vshll.u32 %v3868_v8, 16 }
  0xae   : > { %v3845_v15 = vpop.permute.xlu0 %1365  ;;  %v1332_v1 = vsel %vm802_vm0, %v1330_v46, %v1331_v59  ;;  %v3925_v46 = vld [vmem:[%s3245_s19 + $0x5c] ss:$0 sps:$4 sm:$0x11]  }
  0xaf   : > { %1259 = vrot.lane.b32.xlu1 %v1198_v34, %s3196_s23  ;;  %v1354_v34 = vrot.slane %v2850_v33, 1  ;;  %v1714_v33 = vshll.u32 %v3871_v47, 16  ;;  %v1618_v18 = vshll.u32 %v3890_v13, 16  ;;  %v1712_v6 = vshrl.u32 %v3871_v47, 16 }
  0xb0   : > { %1243 = vrot.lane.b32.xlu0 %v1102_v14, %s3196_s23  ;;  %v2753_v14 = vld [vmem:[%s3245_s19 + $0xa8] sm:$0xe]  ;;  %v1623_v57 = vshll.u32 %v3925_v46, 16 }
  0xb1   : > { %v3863_v21 = vpop.permute.xlu1 %1491  ;;  %v1356_v37 = vsel %vm802_vm0, %v1354_v34, %v1355_v58  ;;  %v1716_v61 = vrot.slane %v1714_v33, 1  ;;  %v1705_v34 = vor.u32 %v1704_v20, %v1700_v51  ;;  %v1709_v58 = vrot.slane %v1707_v42, 1  ;;  %v229_v20 = vld [vmem:[%s3245_s19 + $0xa8] sm:$0xf]  ;;  %v3937_v42 = vld [vmem:[%s3245_s19 + $0xac] sm:$0xf] }
  0xb2   : > { %v3877_v43 = vpop.permute.xlu0 %1475  ;;  %v1719_v33 = vshll.u32 %v3917_v16, 16  ;;  %v1620_v51 = vrot.slane %v1618_v18, 1 }
  0xb3   : > { %1261 = vrot.lane.b32.xlu1 %v1210_v28, %s3196_s23  ;;  %v2897_v28 = vcombine.low %v2753_v14, %v3834_v44  ;;  %v1604_v44 = vshrl.u32 %v3868_v8, 16  ;;  %v1608_v14 = vrot.slane %v1606_v19, 1  ;;  %v1616_v19 = vshrl.u32 %v3890_v13, 16 }
  0xb4   : > { %1245 = vrot.lane.b32.xlu0 %v1114_v5, %s3196_s23  ;;  %v1909_v5 = vsel %vm1907_vm3, %v3282_v23, %v3747_v60  ;;  %v1958_v23 = vsel %vm1940_vm4, %v1925_v22, %v3705_v63  ;;  %v1710_v18 = vsel %vm529_vm1, %v1705_v34, %v1709_v58 }
  0xb5   : > { %v3892_v40 = vpop.permute.xlu1 %1493  ;;  %v1942_v59 = vsel %vm1940_vm4, %v1909_v5, %v3715_v4  ;;  %v1991_v4 = vsel %vm1973_vm5, %v1958_v23, %v3673_v41  ;;  %v1609_v5 = vor.u32 %v1608_v14, %v1604_v44  ;;  %v3943_v26 = vrot.slane %v2897_v28, 1  ;;  %v3955_v41 = vld [vmem:[%s3245_s19 + $0x4c] sm:$0xf] }
  0xb6   : > { %v3897_v62 = vpop.permute.xlu0 %1477  ;;  %v1621_v14 = vor.u32 %v1620_v51, %v1616_v19  ;;  %v4016_v51 = vld [vmem:[%s3245_s19 + $0xb8] sm:$0xf] }
  0xb7   : > { %1387 = vrot.lane.b32.xlu1 %v1353_v48, %s3197_s24  ;;  %v2745_v48 = vld [vmem:[%s3245_s19 + $0x48] sm:$0xe] }
  0xb8   : > { %1371 = vrot.lane.b32.xlu0 %v1329_v3, %s3197_s24  ;;  %v1611_v3 = vshll.u32 %v3907_v35, 16  ;;  %v2889_v63 = vcombine.low %v2745_v48, %v3851_v10  ;;  %v1975_v10 = vsel %vm1973_vm5, %v1942_v59, %v3687_v49  ;;  %v3964_v49 = vcombine.low %v229_v20, %v3937_v42 }
  0xb9   : > { %v1764_v56 = vpop.permute.xlu1 %1763 }
  0xba   : > { %v1748_v60 = vpop.permute.xlu0 %1747 }
  0xbb   : > { %1389 = vrot.lane.b32.xlu1 %v1356_v37, %s3197_s24  ;;  %v1717_v37 = vor.u32 %v1716_v61, %v1712_v6  ;;  %v2008_v61 = vsel %vm2006_vm6, %v1975_v10, %v3804_v52  ;;  %v1721_v52 = vrot.slane %v1719_v33, 1  ;;  %v231_v33 = vld [vmem:[%s3245_s19 + $0xb4] sm:$0xf] }
  0xbc   : > { %1373 = vrot.lane.b32.xlu0 %v1332_v1, %s3197_s24  ;;  %v2024_v1 = vsel %vm2006_vm6, %v1991_v4, %v3798_v45  ;;  %v1613_v45 = vrot.slane %v1611_v3, 1  ;;  %v2041_v28 = vsel %vm2039_vm7, %v2008_v61, %v3828_v12  ;;  %v3979_v12 = vcombine.low %v213_v29, %v3955_v41 }
  0xbd   : > { %v3941_v22 = vpop.permute.xlu1 %1765  ;;  %v2057_v6 = vsel %vm2039_vm7, %v2024_v1, %v3825_v27  ;;  %v1927_v27 = vsel %vm1907_vm3, %v3289_v31, %v3761_v17  ;;  %v1625_v31 = vrot.slane %v1623_v57, 1  ;;  %v3987_v17 = vld [vmem:[%s3245_s19 + $0xb0] ss:$0 sps:$4 sm:$0x11]   ;;  %v1864_v29 = vrot.slane %v3881_v11, 1 }
  0xbe   : > { %v3949_v48 = vpop.permute.xlu0 %1749  ;;  %v2090_v44 = vsel %vm2072_vm8, %v2057_v6, %v3863_v21  ;;  %v1911_v21 = vsel %vm1907_vm3, %v3295_v38, %v3743_v54  ;;  %v1839_v38 = vrot.slane %v2889_v63, 1  ;;  %v701_v54 = vshll.u32 %v3964_v49, 16 }
  0xbf   : > { %1499 = vrot.lane.b32.xlu1 %v3848_v36, %s3198_s25  ;;  %v2074_v36 = vsel %vm2072_vm8, %v2041_v28, %v3877_v43  ;;  %v2123_v23 = vsel %vm2105_vm9, %v2090_v44, %v1764_v56  ;;  %v1960_v56 = vsel %vm1940_vm4, %v1927_v27, %v3723_v24  ;;  %v1614_v57 = vsel %vm529_vm1, %v1609_v5, %v1613_v45  ;;  %v215_v5 = vld [vmem:[%s3245_s19 + $0x54] sm:$0xf] }
  0xc0   : > { %1483 = vrot.lane.b32.xlu0 %v3868_v8, %s3198_s25  ;;  %v2107_v8 = vsel %vm2105_vm9, %v2074_v36, %v1748_v60  ;;  %v1840_v11 = vrot.slane %v3907_v35, 1  ;;  %v4004_v60 = vld [vmem:[%s3245_s19 + $0x50] ss:$0 sps:$4 sm:$0x11]   ;;  %v1993_v3 = vsel %vm1973_vm5, %v1960_v56, %v3784_v2  ;;  %v1944_v24 = vsel %vm1940_vm4, %v1911_v21, %v3736_v55  ;;  %v2754_v45 = vld [vmem:[%s3245_s19 + $0xb4] sm:$0xe] }
  0xc1   : > { %v1892_v34 = vpop.permute.xlu1 %1891  ;;  %v605_v63 = vshll.u32 %v3979_v12, 16  ;;  %v1977_v35 = vsel %vm1973_vm5, %v1944_v24, %v3788_v32  ;;  %v2026_v2 = vsel %vm2006_vm6, %v1993_v3, %v3812_v0  ;;  %v1626_v55 = vsel %vm529_vm1, %v1621_v14, %v1625_v31  ;;  %v2746_v28 = vld [vmem:[%s3245_s19 + $0x54] sm:$0xe] }
  0xc2   : > { %v1876_v58 = vpop.permute.xlu0 %1875  ;;  %v2156_v59 = vsel %vm2138_vm10, %v2123_v23, %v1892_v34  ;;  %v706_v4 = vshll.u32 %v3987_v17, 16  ;;  %v2010_v1 = vsel %vm2006_vm6, %v1977_v35, %v3818_v9  ;;  %v2059_v10 = vsel %vm2039_vm7, %v2026_v2, %v3841_v7 }
  0xc3   : > { %1501 = vrot.lane.b32.xlu1 %v3871_v47, %s3198_s25  ;;  %v2140_v43 = vsel %vm2138_vm10, %v2107_v8, %v1876_v58  ;;  %2965 = vmatprep.mubr.msk.bf16.mxu1 %vm2198_vm11, %v2156_v59  ;;  %v1722_v47 = vsel %vm529_vm1, %v1717_v37, %v1721_v52  ;;  %v4028_v37 = vld [vmem:[%s3245_s19 + $0x58] sm:$0xf]  ;;  %v703_v32 = vrot.slane %v701_v54, 1  ;;  %v603_v0 = vshrl.u32 %v3979_v12, 16 }
  0xc4   : > { %1485 = vrot.lane.b32.xlu0 %v3890_v13, %s3198_s25  ;;  %2949 = vmatprep.mubr.msk.bf16.mxu0 %vm2198_vm11, %v2140_v43  ;;  %v699_v13 = vshrl.u32 %v3964_v49, 16  ;;  %v2043_v61 = vsel %vm2039_vm7, %v2010_v1, %v3845_v15  ;;  %v2092_v6 = vsel %vm2072_vm8, %v2059_v10, %v3892_v40  ;;  %v610_v9 = vshll.u32 %v4004_v60, 16  ;;  %v4067_v8 = vld [vmem:[%s3245_s19 + $0xbc] ss:$0 sps:$4 sm:$0x11]  }
  0xc5   : > { %v4010_v19 = vpop.permute.xlu1 %742  ;;  %v4045_v44 = vcombine.low %v231_v33, %v4016_v51  ;;  %v2076_v7 = vsel %vm2072_vm8, %v2043_v61, %v3897_v62  ;;  %v607_v15 = vrot.slane %v605_v63, 1  ;;  %v4052_v40 = vcombine.low %v215_v5, %v4028_v37  ;;  %v4074_v43 = vld [vmem:[%s3245_s19 + $0x5c] ss:$0 sps:$4 sm:$0x11]  }
  0xc6   : > { %v4022_v20 = vpop.permute.xlu0 %726  ;;  %v2109_v14 = vsel %vm2105_vm9, %v2076_v7, %v3949_v48  ;;  %v2898_v23 = vcombine.low %v2754_v45, %v3855_v39  ;;  %v2890_v62 = vcombine.low %v2746_v28, %v3875_v30  ;;  %v704_v48 = vor.u32 %v703_v32, %v699_v13  ;;  %v264_v28 = vld [vmem:[%s3245_s19 + $0xb4] sm:$0xe] }
  0xc7   : > { %1771 = vrot.lane.b32.xlu1 %v1710_v18, %s3199_s26  ;;  %v2125_v18 = vsel %vm2105_vm9, %v2092_v6, %v3941_v22  ;;  %v1865_v22 = vsel %vm802_vm0, %v3943_v26, %v1864_v29  ;;  %v708_v21 = vrot.slane %v706_v4, 1  ;;  %v713_v39 = vshll.u32 %v4045_v44, 16  ;;  %v256_v7 = vld [vmem:[%s3245_s19 + $0x54] sm:$0xe] }
  0xc8   : > { %1755 = vrot.lane.b32.xlu0 %v1614_v57, %s3199_s26  ;;  %v1841_v58 = vsel %vm802_vm0, %v1839_v38, %v1840_v11  ;;  %v608_v59 = vor.u32 %v607_v15, %v603_v0  ;;  %v612_v31 = vrot.slane %v610_v9, 1  ;;  %v617_v54 = vshll.u32 %v4052_v40, 16 }
  0xc9   : > { %v1894_v52 = vpop.permute.xlu1 %1893  ;;  %v1866_v26 = vrot.slane %v2898_v23, 1  ;;  %v1867_v29 = vrot.slane %v3917_v16, 1  ;;  %v1842_v57 = vrot.slane %v2890_v62, 1  ;;  %v709_v38 = vsel %vm529_vm1, %v704_v48, %v708_v21  ;;  %v2657_v62 = vld [vmem:[%s3245_s19 + $0xb4] sm:$0xf] }
  0xca   : > { %v2158_v27 = vsel %vm2138_vm10, %v2125_v18, %v1894_v52  ;;  %v1878_v36 = vpop.permute.xlu0 %1877  ;;  %v711_v11 = vshrl.u32 %v4045_v44, 16  ;;  %v715_v3 = vrot.slane %v713_v39, 1  ;;  %v718_v24 = vshll.u32 %v4067_v8, 16  ;;  %v2641_v48 = vld [vmem:[%s3245_s19 + $0x54] sm:$0xf] }
  0xcb   : > { %v2142_v34 = vsel %vm2138_vm10, %v2109_v14, %v1878_v36  ;;  %1773 = vrot.lane.b32.xlu1 %v1722_v47, %s3199_s26  ;;  %2966 = vmatmul.mubr.msk.bf16.vlgmr.msra.gmra.mxu1 %vm2198_vm11, %v2158_v27  ;;  %v1843_v47 = vrot.slane %v3925_v46, 1  ;;  %v613_v63 = vsel %vm529_vm1, %v608_v59, %v612_v31  ;;  %v615_v33 = vshrl.u32 %v4052_v40, 16  ;;  %v263_v46 = vld [vmem:[%s3245_s19 + $0xa8] sm:$0xe] }
  0xcc   : > { %1757 = vrot.lane.b32.xlu0 %v1626_v55, %s3199_s26  ;;  %2950 = vmatmul.mubr.msk.bf16.vlgmr.msra.gmra.mxu0 %vm2198_vm11, %v2142_v34  ;;  %v619_v35 = vrot.slane %v617_v54, 1  ;;  %v622_v16 = vshll.u32 %v4074_v43, 16  ;;  %v255_v55 = vld [vmem:[%s3245_s19 + $0x48] sm:$0xe]  ;;  %v1868_v4 = vsel %vm802_vm0, %v1866_v26, %v1867_v29  ;;  %v716_v5 = vor.u32 %v715_v3, %v711_v11  ;;  %v4119_v34 = vld [vmem:[%s3245_s19 + $0xb8] sm:$0xf] }
  0xcd   : > { %v4070_v30 = vpop.permute.xlu1 %744  ;;  %v720_v1 = vrot.slane %v718_v24, 1  ;;  %v2803_v10 = vcombine.low %v263_v46, %v3937_v42  ;;  %v1844_v0 = vsel %vm802_vm0, %v1842_v57, %v1843_v47  ;;  %v2795_v45 = vcombine.low %v255_v55, %v3955_v41  ;;  %v2659_v26 = vld [vmem:[%s3245_s19 + $0xc0] sm:$0xf]  ;;  %v4139_v29 = vld [vmem:[%s3245_s19 + $0xc4] sm:$0xf] }
  0xce   : > { %v4077_v56 = vpop.permute.xlu0 %728  ;;  %v620_v61 = vor.u32 %v619_v35, %v615_v33  ;;  %v624_v6 = vrot.slane %v622_v16, 1  ;;  %v846_v52 = vrot.slane %v3987_v17, 1  ;;  %v2804_v15 = vcombine.low %v264_v28, %v4016_v51  ;;  %v4125_v17 = vld [vmem:[%s3245_s19 + $0x58] sm:$0xf]  ;;  %v2643_v47 = vld [vmem:[%s3245_s19 + $0x60] sm:$0xf] }
  0xcf   : > { %1899 = vrot.lane.b32.xlu1 %v1865_v22, %s3200_s27  ;;  %v721_v42 = vsel %vm529_vm1, %v716_v5, %v720_v1  ;;  %v845_v18 = vrot.slane %v2803_v10, 1  ;;  %v821_v27 = vrot.slane %v2795_v45, 1  ;;  %v822_v36 = vrot.slane %v4004_v60, 1  ;;  %v4155_v24 = vld [vmem:[%s3245_s19 + $0x5c] ss:$0 sps:$4 sm:$0x11]  }
  0xd0   : > { %1883 = vrot.lane.b32.xlu0 %v1841_v58, %s3200_s27  ;;  %v625_v41 = vsel %vm529_vm1, %v620_v61, %v624_v6  ;;  %v2796_v23 = vcombine.low %v256_v7, %v4028_v37  ;;  %v848_v51 = vrot.slane %v2804_v15, 1  ;;  %v849_v37 = vrot.slane %v4067_v8, 1  ;;  %v4149_v8 = vld [vmem:[%s3245_s19 + $0xbc] ss:$0 sps:$4 sm:$0x11]  }
  0xd1   : > { %v4086_v13 = vpop.permute.xlu1 %871  ;;  %v847_v60 = vsel %vm802_vm0, %v845_v18, %v846_v52  ;;  %v2819_v21 = vcombine.low %v2657_v62, %v4119_v34  ;;  %v823_v58 = vsel %vm802_vm0, %v821_v27, %v822_v36  ;;  %v825_v31 = vrot.slane %v4074_v43, 1  ;;  %v4168_v10 = vld [vmem:[%s3245_s19 + $0xc8] ss:$0 sps:$4 sm:$0x11]  }
  0xd2   : > { %v4092_v2 = vpop.permute.xlu0 %855  ;;  %v824_v59 = vrot.slane %v2796_v23, 1  ;;  %v2811_v54 = vcombine.low %v2641_v48, %v4125_v17  ;;  %v850_v11 = vsel %vm802_vm0, %v848_v51, %v849_v37  ;;  %v2820_v43 = vcombine.low %v2659_v26, %v4139_v29  ;;  %v4173_v28 = vld [vmem:[%s3245_s19 + $0x68] ss:$0 sps:$4 sm:$0x11]   ;;  %v2691_v37 = vld [vmem:[%s3245_s19 + $0xb4] sm:$0xe] }
  0xd3   : > { %750 = vrot.lane.b32.xlu1 %v709_v38, %s3195_s22  ;;  %v4145_v38 = vld [vmem:[%s3245_s19 + $0x64] sm:$0xf]  ;;  %v1214_v3 = vshll.u32 %v2819_v21, 16  ;;  %v1212_v55 = vshrl.u32 %v2819_v21, 16  ;;  %v1123_v1 = vshll.u32 %v4155_v24, 16  ;;  %v1231_v36 = vshll.u32 %v4168_v10, 16 }
  0xd4   : > { %734 = vrot.lane.b32.xlu0 %v613_v63, %s3195_s22  ;;  %v826_v33 = vsel %vm802_vm0, %v824_v59, %v825_v31  ;;  %v2812_v35 = vcombine.low %v2643_v47, %v4145_v38  ;;  %v1118_v16 = vshll.u32 %v2811_v54, 16  ;;  %v1116_v6 = vshrl.u32 %v2811_v54, 16 }
  0xd5   : > { %v4099_v32 = vpop.permute.xlu1 %873  ;;  %v1216_v5 = vrot.slane %v1214_v3, 1  ;;  %v1224_v52 = vshrl.u32 %v2820_v43, 16  ;;  %v1135_v51 = vshll.u32 %v4173_v28, 16  ;;  %v2851_v26 = vcombine.low %v2691_v37, %v4119_v34 }
  0xd6   : > { %v4104_v9 = vpop.permute.xlu0 %857  ;;  %v1120_v45 = vrot.slane %v1118_v16, 1  ;;  %v1130_v7 = vshll.u32 %v2812_v35, 16  ;;  %v1128_v48 = vshrl.u32 %v2812_v35, 16 }
  0xd7   : > { %1901 = vrot.lane.b32.xlu1 %v1868_v4, %s3200_s27  ;;  %v1219_v4 = vshll.u32 %v4149_v8, 16  ;;  %v1217_v15 = vor.u32 %v1216_v5, %v1212_v55  ;;  %v2692_v55 = vld [vmem:[%s3245_s19 + $0xc0] sm:$0xe]  ;;  %v1358_v5 = vrot.slane %v4149_v8, 1 }
  0xd8   : > { %1885 = vrot.lane.b32.xlu0 %v1844_v0, %s3200_s27  ;;  %v1226_v0 = vshll.u32 %v2820_v43, 16  ;;  %v1121_v62 = vor.u32 %v1120_v45, %v1116_v6 }
  0xd9   : > { %v4112_v14 = vpop.permute.xlu1 %983  ;;  %v1221_v18 = vrot.slane %v1219_v4, 1  ;;  %v1357_v4 = vrot.slane %v2851_v26, 1 }
  0xda   : > { %v4121_v22 = vpop.permute.xlu0 %967  ;;  %v1228_v27 = vrot.slane %v1226_v0, 1  ;;  %v4206_v0 = vld [vmem:[%s3245_s19 + $0xc4] sm:$0xf] }
  0xdb   : > { %752 = vrot.lane.b32.xlu1 %v721_v42, %s3195_s22  ;;  %v1222_v59 = vsel %vm529_vm1, %v1217_v15, %v1221_v18  ;;  %v1334_v18 = vrot.slane %v4155_v24, 1  ;;  %v2705_v15 = vld [vmem:[%s3245_s19 + $0x60] sm:$0xf]  ;;  %v1359_v24 = vsel %vm802_vm0, %v1357_v4, %v1358_v5  ;;  %v4257_v4 = vld [vmem:[%s3245_s19 + $0xd4] ss:$0 sps:$4 sm:$0x11]  }
  0xdc   : > { %736 = vrot.lane.b32.xlu0 %v625_v41, %s3195_s22  ;;  %v1125_v41 = vrot.slane %v1123_v1, 1  ;;  %v1229_v31 = vor.u32 %v1228_v27, %v1224_v52  ;;  %v2852_v1 = vcombine.low %v2692_v55, %v4139_v29  ;;  %v2723_v27 = vld [vmem:[%s3245_s19 + $0xcc] sm:$0xf] }
  0xdd   : > { %v4132_v39 = vpop.permute.xlu1 %985 }
  0xde   : > { %v4141_v57 = vpop.permute.xlu0 %969 }
  0xdf   : > { %879 = vrot.lane.b32.xlu1 %v847_v60, %s3194_s21  ;;  %v1132_v60 = vrot.slane %v1130_v7, 1 }
  0xe0   : > { %863 = vrot.lane.b32.xlu0 %v823_v58, %s3194_s21  ;;  %v2683_v58 = vld [vmem:[%s3245_s19 + $0x54] sm:$0xe] }
  0xe1   : > { %v4157_v63 = vpop.permute.xlu1 %1255  ;;  %v1133_v3 = vor.u32 %v1132_v60, %v1128_v48  ;;  %v2843_v16 = vcombine.low %v2683_v58, %v4125_v17  ;;  %v2721_v17 = vld [vmem:[%s3245_s19 + $0xc0] sm:$0xf]  ;;  %v4230_v60 = vld [vmem:[%s3245_s19 + $0xc8] ss:$0 sps:$4 sm:$0x11]  }
  0xe2   : > { %v4161_v46 = vpop.permute.xlu0 %1239  ;;  %v2867_v29 = vcombine.low %v2721_v17, %v4206_v0 }
  0xe3   : > { %881 = vrot.lane.b32.xlu1 %v850_v11, %s3194_s21  ;;  %v1126_v11 = vsel %vm529_vm1, %v1121_v62, %v1125_v41  ;;  %v1333_v7 = vrot.slane %v2843_v16, 1  ;;  %v4215_v41 = vld [vmem:[%s3245_s19 + $0x64] sm:$0xf]  ;;  %v1361_v62 = vrot.slane %v4168_v10, 1  ;;  %v1731_v16 = vshll.u32 %v4230_v60, 16 }
  0xe4   : > { %865 = vrot.lane.b32.xlu0 %v826_v33, %s3194_s21  ;;  %v1137_v33 = vrot.slane %v1135_v51, 1  ;;  %v2859_v48 = vcombine.low %v2705_v15, %v4215_v41  ;;  %v4246_v10 = vld [vmem:[%s3245_s19 + $0x68] ss:$0 sps:$4 sm:$0x11]  }
  0xe5   : > { %v4170_v61 = vpop.permute.xlu1 %1257  ;;  %v1335_v37 = vsel %vm802_vm0, %v1333_v7, %v1334_v18  ;;  %v1635_v17 = vshll.u32 %v4246_v10, 16  ;;  %v1929_v7 = vsel %vm1907_vm3, %v3430_v50, %v4010_v19 }
  0xe6   : > { %v4175_v42 = vpop.permute.xlu0 %1241  ;;  %v1138_v45 = vsel %vm529_vm1, %v1133_v3, %v1137_v33  ;;  %v1726_v3 = vshll.u32 %v2867_v29, 16 }
  0xe7   : > { %991 = vrot.lane.b32.xlu1 %v2819_v21, %s3193_s20 }
  0xe8   : > { %975 = vrot.lane.b32.xlu0 %v2811_v54, %s3193_s20  ;;  %v1233_v54 = vrot.slane %v1231_v36, 1  ;;  %v4223_v36 = vld [vmem:[%s3245_s19 + $0xd0] sm:$0xf]  ;;  %v1728_v18 = vrot.slane %v1726_v3, 1  ;;  %v1637_v3 = vrot.slane %v1635_v17, 1 }
  0xe9   : > { %v4180_v23 = vpop.permute.xlu1 %1383  ;;  %v4240_v26 = vcombine.low %v2723_v27, %v4223_v36  ;;  %v1913_v27 = vsel %vm1907_vm3, %v3433_v53, %v4022_v20  ;;  %v1743_v53 = vshll.u32 %v4257_v4, 16 }
  0xea   : > { %v4184_v21 = vpop.permute.xlu0 %1367  ;;  %v1234_v34 = vsel %vm529_vm1, %v1229_v31, %v1233_v54  ;;  %v2707_v31 = vld [vmem:[%s3245_s19 + $0x6c] sm:$0xf]  ;;  %v1946_v50 = vsel %vm1940_vm4, %v1913_v27, %v4092_v2 }
  0xeb   : > { %993 = vrot.lane.b32.xlu1 %v2820_v43, %s3193_s20  ;;  %v1736_v15 = vshrl.u32 %v4240_v26, 16 }
  0xec   : > { %977 = vrot.lane.b32.xlu0 %v2812_v35, %s3193_s20  ;;  %v2684_v35 = vld [vmem:[%s3245_s19 + $0x60] sm:$0xe] }
  0xed   : > { %v4191_v47 = vpop.permute.xlu1 %1385  ;;  %v2844_v52 = vcombine.low %v2684_v35, %v4145_v38  ;;  %v1360_v38 = vrot.slane %v2852_v1, 1  ;;  %v1724_v1 = vshrl.u32 %v2867_v29, 16 }
  0xee   : > { %v4196_v43 = vpop.permute.xlu0 %1369 }
  0xef   : > { %1263 = vrot.lane.b32.xlu1 %v1222_v59, %s3196_s23  ;;  %v1336_v58 = vrot.slane %v2844_v52, 1  ;;  %v1337_v59 = vrot.slane %v4173_v28, 1  ;;  %v1362_v33 = vsel %vm802_vm0, %v1360_v38, %v1361_v62  ;;  %v1630_v28 = vshll.u32 %v2859_v48, 16 }
  0xf0   : > { %1247 = vrot.lane.b32.xlu0 %v1126_v11, %s3196_s23  ;;  %v4243_v11 = vld [vmem:[%s3245_s19 + $0x70] sm:$0xf]  ;;  %v1628_v52 = vshrl.u32 %v2859_v48, 16  ;;  %v1733_v38 = vrot.slane %v1731_v16, 1  ;;  %v1729_v16 = vor.u32 %v1728_v18, %v1724_v1 }
  0xf1   : > { %v4208_v6 = vpop.permute.xlu1 %1495  ;;  %v1338_v35 = vsel %vm802_vm0, %v1336_v58, %v1337_v59  ;;  %v1632_v62 = vrot.slane %v1630_v28, 1 }
  0xf2   : > { %v4217_v8 = vpop.permute.xlu0 %1479 }
  0xf3   : > { %1265 = vrot.lane.b32.xlu1 %v1234_v34, %s3196_s23  ;;  %v4254_v34 = vcombine.low %v2707_v31, %v4243_v11  ;;  %v1633_v17 = vor.u32 %v1632_v62, %v1628_v52  ;;  %v1931_v52 = vsel %vm1907_vm3, %v3468_v25, %v4070_v30 }
  0xf4   : > { %1249 = vrot.lane.b32.xlu0 %v1138_v45, %s3196_s23  ;;  %v1738_v45 = vshll.u32 %v4240_v26, 16 }
  0xf5   : > { %v4232_v51 = vpop.permute.xlu1 %1497  ;;  %v1642_v20 = vshll.u32 %v4254_v34, 16  ;;  %v1640_v28 = vshrl.u32 %v4254_v34, 16  ;;  %v1638_v25 = vsel %vm529_vm1, %v1633_v17, %v1637_v3 }
  0xf6   : > { %v4237_v54 = vpop.permute.xlu0 %1481 }
  0xf7   : > { %1391 = vrot.lane.b32.xlu1 %v1359_v24, %s3197_s24  ;;  %v1962_v24 = vsel %vm1940_vm4, %v1929_v7, %v4086_v13  ;;  %v1979_v13 = vsel %vm1973_vm5, %v1946_v50, %v4121_v22  ;;  %v1644_v7 = vrot.slane %v1642_v20, 1 }
  0xf8   : > { %1375 = vrot.lane.b32.xlu0 %v1335_v37, %s3197_s24  ;;  %v4273_v37 = vld [vmem:[%s3245_s19 + $0x74] ss:$0 sps:$4 sm:$0x11]   ;;  %v1995_v19 = vsel %vm1973_vm5, %v1962_v24, %v4112_v14  ;;  %v2012_v2 = vsel %vm2006_vm6, %v1979_v13, %v4161_v46 }
  0xf9   : > { %v1768_v55 = vpop.permute.xlu1 %1767  ;;  %v2028_v59 = vsel %vm2006_vm6, %v1995_v19, %v4157_v63  ;;  %v2045_v22 = vsel %vm2039_vm7, %v2012_v2, %v4184_v21  ;;  %v1647_v46 = vshll.u32 %v4273_v37, 16  ;;  %v2748_v19 = vld [vmem:[%s3245_s19 + $0x6c] sm:$0xe] }
  0xfa   : > { %v1752_v5 = vpop.permute.xlu0 %1751  ;;  %v2061_v14 = vsel %vm2039_vm7, %v2028_v59, %v4180_v23  ;;  %v2078_v23 = vsel %vm2072_vm8, %v2045_v22, %v4217_v8  ;;  %v1849_v22 = vrot.slane %v4273_v37, 1 }
  0xfb   : > { %1393 = vrot.lane.b32.xlu1 %v1362_v33, %s3197_s24  ;;  %v1740_v33 = vrot.slane %v1738_v45, 1  ;;  %v2094_v63 = vsel %vm2072_vm8, %v2061_v14, %v4208_v6  ;;  %v1745_v45 = vrot.slane %v1743_v53, 1  ;;  %v2111_v18 = vsel %vm2105_vm9, %v2078_v23, %v1752_v5  ;;  %v4559_v5 = vld [vmem:[#allocation2_spill] sm:$0xff] }
  0xfc   : > { %1377 = vrot.lane.b32.xlu0 %v1338_v35, %s3197_s24  ;;  %v2755_v35 = vld [vmem:[%s3245_s19 + $0xc0] sm:$0xe]  ;;  %v1649_v30 = vrot.slane %v1647_v46, 1 }
  0xfd   : > { %v4279_v58 = vpop.permute.xlu1 %1769  ;;  %v1741_v24 = vor.u32 %v1740_v33, %v1736_v15  ;;  %v2899_v6 = vcombine.low %v2755_v35, %v4206_v0  ;;  %v1915_v0 = vsel %vm1907_vm3, %v4559_v5, %v4077_v56  ;;  %v1964_v15 = vsel %vm1940_vm4, %v1931_v52, %v4099_v32  ;;  %v2756_v32 = vld [vmem:[%s3245_s19 + $0xcc] sm:$0xe] }
  0xfe   : > { %v4287_v31 = vpop.permute.xlu0 %1753  ;;  %v1645_v56 = vor.u32 %v1644_v7, %v1640_v28  ;;  %v2900_v33 = vcombine.low %v2756_v32, %v4223_v36 }
  0xff   : > { %1503 = vrot.lane.b32.xlu1 %v2867_v29, %s3198_s25  ;;  %v2127_v29 = vsel %vm2105_vm9, %v2094_v63, %v1768_v55  ;;  %v1734_v55 = vsel %vm529_vm1, %v1729_v16, %v1733_v38  ;;  %v1997_v38 = vsel %vm1973_vm5, %v1964_v15, %v4132_v39  ;;  %v1869_v13 = vrot.slane %v2899_v6, 1 }
 0x100   : > { %1487 = vrot.lane.b32.xlu0 %v2859_v48, %s3198_s25  ;;  %v2747_v48 = vld [vmem:[%s3245_s19 + $0x60] sm:$0xe]  ;;  %v2030_v53 = vsel %vm2006_vm6, %v1997_v38, %v4170_v61  ;;  %v4560_v38 = vld [vmem:[#allocation3_spill] sm:$0xff] }
 0x101   : > { %v1896_v1 = vpop.permute.xlu1 %1895  ;;  %v2891_v50 = vcombine.low %v2747_v48, %v4215_v41  ;;  %v2063_v59 = vsel %vm2039_vm7, %v2030_v53, %v4191_v47  ;;  %v1870_v41 = vrot.slane %v4230_v60, 1 }
 0x102   : > { %v2160_v21 = vsel %vm2138_vm10, %v2127_v29, %v1896_v1  ;;  %v1880_v27 = vpop.permute.xlu0 %1879  ;;  %v2096_v3 = vsel %vm2072_vm8, %v2063_v59, %v4232_v51 }
 0x103   : > { %v2144_v8 = vsel %vm2138_vm10, %v2111_v18, %v1880_v27  ;;  %1505 = vrot.lane.b32.xlu1 %v4240_v26, %s3198_s25  ;;  %2969 = vmatprep.mubr.msk.bf16.mxu1 %vm2198_vm11, %v2160_v21  ;;  %v1948_v26 = vsel %vm1940_vm4, %v1915_v0, %v4104_v9  ;;  %v1746_v9 = vsel %vm529_vm1, %v1741_v24, %v1745_v45  ;;  %v1845_v14 = vrot.slane %v2891_v50, 1  ;;  %v4561_v50 = vld [vmem:[#allocation4_spill] sm:$0xff] }
 0x104   : > { %1489 = vrot.lane.b32.xlu0 %v4254_v34, %s3198_s25  ;;  %2953 = vmatprep.mubr.msk.bf16.mxu0 %vm2198_vm11, %v2144_v8  ;;  %v1981_v34 = vsel %vm1973_vm5, %v1948_v26, %v4141_v57  ;;  %v1846_v57 = vrot.slane %v4246_v10, 1  ;;  %v2129_v60 = vsel %vm2105_vm9, %v2096_v3, %v4279_v58  ;;  %v1650_v10 = vsel %vm529_vm1, %v1645_v56, %v1649_v30 }
 0x105   : > { %v4330_v62 = vpop.permute.xlu1 %746  ;;  %v2014_v39 = vsel %vm2006_vm6, %v1981_v34, %v4175_v42  ;;  %v2892_v42 = vcombine.low %v2748_v19, %v4243_v11  ;;  %v1872_v11 = vrot.slane %v2900_v33, 1  ;;  %v1873_v58 = vrot.slane %v4257_v4, 1 }
 0x106   : > { %v4339_v20 = vpop.permute.xlu0 %730  ;;  %v2047_v61 = vsel %vm2039_vm7, %v2014_v39, %v4196_v43  ;;  %v1933_v56 = vsel %vm1907_vm3, %v4560_v38, %v4330_v62 }
 0x107   : > { %1775 = vrot.lane.b32.xlu1 %v1734_v55, %s3199_s26  ;;  %v2080_v47 = vsel %vm2072_vm8, %v2047_v61, %v4237_v54  ;;  %v1871_v54 = vsel %vm802_vm0, %v1869_v13, %v1870_v41  ;;  %v1848_v35 = vrot.slane %v2892_v42, 1  ;;  %v1874_v17 = vsel %vm802_vm0, %v1872_v11, %v1873_v58 }
 0x108   : > { %1759 = vrot.lane.b32.xlu0 %v1638_v25, %s3199_s26  ;;  %v2113_v43 = vsel %vm2105_vm9, %v2080_v47, %v4287_v31  ;;  %v1847_v31 = vsel %vm802_vm0, %v1845_v14, %v1846_v57  ;;  %v1917_v32 = vsel %vm1907_vm3, %v4561_v50, %v4339_v20 }
 0x109   : > { %v1898_v2 = vpop.permute.xlu1 %1897  ;;  %v1850_v23 = vsel %vm802_vm0, %v1848_v35, %v1849_v22 }
 0x10a   : > { %v2162_v51 = vsel %vm2138_vm10, %v2129_v60, %v1898_v2  ;;  %v1882_v16 = vpop.permute.xlu0 %1881  ;;  %v4562_v2 = vld [vmem:[#allocation5_spill] sm:$0xff] }
 0x10b   : > { %v2146_v36 = vsel %vm2138_vm10, %v2113_v43, %v1882_v16  ;;  %1777 = vrot.lane.b32.xlu1 %v1746_v9, %s3199_s26  ;;  %2970 = vmatmul.mubr.msk.bf16.gmra.mxu1 %vm2198_vm11, %v2162_v51  ;;  %v4563_v43 = vld [vmem:[#allocation6_spill] sm:$0xff] }
 0x10c   : > { %1761 = vrot.lane.b32.xlu0 %v1650_v10, %s3199_s26  ;;  %2954 = vmatmul.mubr.msk.bf16.gmra.mxu0 %vm2198_vm11, %v2146_v36 }
 0x10d   : > { %v749_v28 = vpop.permute.xlu1 %748 }
 0x10e   : > { %v733_v63 = vpop.permute.xlu0 %732  ;;  %v1935_v10 = vsel %vm1907_vm3, %v4562_v2, %v749_v28 }
 0x10f   : > { %1903 = vrot.lane.b32.xlu1 %v1871_v54, %s3200_s27  ;;  %v1919_v51 = vsel %vm1907_vm3, %v4563_v43, %v733_v63 }
 0x110   : > { %1887 = vrot.lane.b32.xlu0 %v1847_v31, %s3200_s27 }
 0x111   : > { %v876_v46 = vpop.permute.xlu1 %875 }
 0x112   : > { %v860_v29 = vpop.permute.xlu0 %859  ;;  %v1966_v19 = vsel %vm1940_vm4, %v1933_v56, %v876_v46 }
 0x113   : > { %1905 = vrot.lane.b32.xlu1 %v1874_v17, %s3200_s27  ;;  %v1950_v34 = vsel %vm1940_vm4, %v1917_v32, %v860_v29 }
 0x114   : > { %1889 = vrot.lane.b32.xlu0 %v1850_v23, %s3200_s27 }
 0x115   : > { %v878_v4 = vpop.permute.xlu1 %877 }
 0x116   : > { %v862_v1 = vpop.permute.xlu0 %861  ;;  %v1968_v16 = vsel %vm1940_vm4, %v1935_v10, %v878_v4 }
 0x117   : > { %v1952_v36 = vsel %vm1940_vm4, %v1919_v51, %v862_v1 }
 0x119   : > { %v988_v45 = vpop.permute.xlu1 %987 }
 0x11a   : > { %v972_v7 = vpop.permute.xlu0 %971  ;;  %v1999_v53 = vsel %vm1973_vm5, %v1966_v19, %v988_v45 }
 0x11b   : > { %v1983_v13 = vsel %vm1973_vm5, %v1950_v34, %v972_v7 }
 0x11d   : > { %v990_v37 = vpop.permute.xlu1 %989 }
 0x11e   : > { %v974_v18 = vpop.permute.xlu0 %973  ;;  %v2001_v54 = vsel %vm1973_vm5, %v1968_v16, %v990_v37 }
 0x11f   : > { %v1985_v58 = vsel %vm1973_vm5, %v1952_v36, %v974_v18 }
 0x121   : > { %v1260_v21 = vpop.permute.xlu1 %1259 }
 0x122   : > { %v1244_v27 = vpop.permute.xlu0 %1243  ;;  %v2032_v39 = vsel %vm2006_vm6, %v1999_v53, %v1260_v21 }
 0x123   : > { %v2016_v41 = vsel %vm2006_vm6, %v1983_v13, %v1244_v27 }
 0x125   : > { %v1262_v24 = vpop.permute.xlu1 %1261 }
 0x126   : > { %v1246_v6 = vpop.permute.xlu0 %1245  ;;  %v2034_v28 = vsel %vm2006_vm6, %v2001_v54, %v1262_v24 }
 0x127   : > { %v2018_v35 = vsel %vm2006_vm6, %v1985_v58, %v1246_v6 }
 0x129   : > { %v1388_v48 = vpop.permute.xlu1 %1387 }
 0x12a   : > { %v1372_v52 = vpop.permute.xlu0 %1371  ;;  %v2065_v62 = vsel %vm2039_vm7, %v2032_v39, %v1388_v48 }
 0x12b   : > { %v2049_v57 = vsel %vm2039_vm7, %v2016_v41, %v1372_v52 }
 0x12d   : > { %v1390_v8 = vpop.permute.xlu1 %1389 }
 0x12e   : > { %v1374_v55 = vpop.permute.xlu0 %1373  ;;  %v2067_v22 = vsel %vm2039_vm7, %v2034_v28, %v1390_v8 }
 0x12f   : > { %v2051_v63 = vsel %vm2039_vm7, %v2018_v35, %v1374_v55 }
 0x131   : > { %v1500_v5 = vpop.permute.xlu1 %1499 }
 0x132   : > { %v1484_v0 = vpop.permute.xlu0 %1483  ;;  %v2098_v20 = vsel %vm2072_vm8, %v2065_v62, %v1500_v5 }
 0x133   : > { %v2082_v61 = vsel %vm2072_vm8, %v2049_v57, %v1484_v0 }
 0x135   : > { %v1502_v15 = vpop.permute.xlu1 %1501 }
 0x136   : > { %v1486_v25 = vpop.permute.xlu0 %1485  ;;  %v2100_v17 = vsel %vm2072_vm8, %v2067_v22, %v1502_v15 }
 0x137   : > { %v2084_v46 = vsel %vm2072_vm8, %v2051_v63, %v1486_v25 }
 0x139   : > { %v1772_v30 = vpop.permute.xlu1 %1771 }
 0x13a   : > { %v1756_v26 = vpop.permute.xlu0 %1755  ;;  %v2131_v3 = vsel %vm2105_vm9, %v2098_v20, %v1772_v30 }
 0x13b   : > { %v2115_v42 = vsel %vm2105_vm9, %v2082_v61, %v1756_v26 }
 0x13d   : > { %v1774_v9 = vpop.permute.xlu1 %1773 }
 0x13e   : > { %v1758_v59 = vpop.permute.xlu0 %1757  ;;  %v2133_v23 = vsel %vm2105_vm9, %v2100_v17, %v1774_v9 }
 0x13f   : > { %v2117_v4 = vsel %vm2105_vm9, %v2084_v46, %v1758_v59 }
 0x141   : > { %v1900_v33 = vpop.permute.xlu1 %1899 }
 0x142   : > { %v2164_v47 = vsel %vm2138_vm10, %v2131_v3, %v1900_v33  ;;  %v1884_v60 = vpop.permute.xlu0 %1883 }
 0x143   : > { %v2148_v14 = vsel %vm2138_vm10, %v2115_v42, %v1884_v60  ;;  %2973 = vmatprep.mubr.msk.bf16.mxu1 %vm2198_vm11, %v2164_v47 }
 0x144   : > { %2957 = vmatprep.mubr.msk.bf16.mxu0 %vm2198_vm11, %v2148_v14 }
 0x145   : > { %v751_v11 = vpop.permute.xlu1 %750 }
 0x146   : > { %v735_v31 = vpop.permute.xlu0 %734  ;;  %v1937_v13 = vsel %vm1907_vm3, %v3964_v49, %v751_v11 }
 0x147   : > { %v1921_v39 = vsel %vm1907_vm3, %v3979_v12, %v735_v31 }
 0x149   : > { %v1902_v29 = vpop.permute.xlu1 %1901 }
 0x14a   : > { %v2166_v1 = vsel %vm2138_vm10, %v2133_v23, %v1902_v29  ;;  %v1886_v45 = vpop.permute.xlu0 %1885 }
 0x14b   : > { %v2150_v7 = vsel %vm2138_vm10, %v2117_v4, %v1886_v45  ;;  %2974 = vmatmul.mubr.msk.bf16.gmra.mxu1 %vm2198_vm11, %v2166_v1  ;;  %v4464_v45 = vld [vmem:[%s4547_s2] ss:$0 sm:$0xff] }
 0x14c   : > { %2958 = vmatmul.mubr.msk.bf16.gmra.mxu0 %vm2198_vm11, %v2150_v7 }
 0x14d   : > { %v753_v37 = vpop.permute.xlu1 %752 }
 0x14e   : > { %v737_v18 = vpop.permute.xlu0 %736  ;;  %v1939_v33 = vsel %vm1907_vm3, %v4045_v44, %v753_v37 }
 0x14f   : > { %v1923_v12 = vsel %vm1907_vm3, %v4052_v40, %v737_v18 }
 0x151   : > { %v880_v21 = vpop.permute.xlu1 %879 }
 0x152   : > { %v864_v27 = vpop.permute.xlu0 %863  ;;  %v1970_v59 = vsel %vm1940_vm4, %v1937_v13, %v880_v21 }
 0x153   : > { %v1954_v41 = vsel %vm1940_vm4, %v1921_v39, %v864_v27 }
 0x155   : > { %v882_v24 = vpop.permute.xlu1 %881 }
 0x156   : > { %v866_v6 = vpop.permute.xlu0 %865  ;;  %v1972_v47 = vsel %vm1940_vm4, %v1939_v33, %v882_v24 }
 0x157   : > { %v1956_v10 = vsel %vm1940_vm4, %v1923_v12, %v866_v6 }
 0x159   : > { %v992_v48 = vpop.permute.xlu1 %991 }
 0x15a   : > { %v976_v52 = vpop.permute.xlu0 %975  ;;  %v2003_v62 = vsel %vm1973_vm5, %v1970_v59, %v992_v48 }
 0x15b   : > { %v1987_v20 = vsel %vm1973_vm5, %v1954_v41, %v976_v52 }
 0x15d   : > { %v994_v8 = vpop.permute.xlu1 %993 }
 0x15e   : > { %v978_v55 = vpop.permute.xlu0 %977  ;;  %v2005_v14 = vsel %vm1973_vm5, %v1972_v47, %v994_v8 }
 0x15f   : > { %v1989_v16 = vsel %vm1973_vm5, %v1956_v10, %v978_v55 }
 0x161   : > { %v1264_v5 = vpop.permute.xlu1 %1263 }
 0x162   : > { %v1248_v0 = vpop.permute.xlu0 %1247  ;;  %v2036_v61 = vsel %vm2006_vm6, %v2003_v62, %v1264_v5 }
 0x163   : > { %v2020_v49 = vsel %vm2006_vm6, %v1987_v20, %v1248_v0 }
 0x165   : > { %v1266_v15 = vpop.permute.xlu1 %1265 }
 0x166   : > { %v1250_v25 = vpop.permute.xlu0 %1249  ;;  %v2038_v36 = vsel %vm2006_vm6, %v2005_v14, %v1266_v15 }
 0x167   : > { %v2022_v58 = vsel %vm2006_vm6, %v1989_v16, %v1250_v25 }
 0x169   : > { %v1392_v30 = vpop.permute.xlu1 %1391 }
 0x16a   : > { %v1376_v26 = vpop.permute.xlu0 %1375  ;;  %v2069_v42 = vsel %vm2039_vm7, %v2036_v61, %v1392_v30 }
 0x16b   : > { %v2053_v60 = vsel %vm2039_vm7, %v2020_v49, %v1376_v26 }
 0x16d   : > { %v1394_v38 = vpop.permute.xlu1 %1393 }
 0x16e   : > { %v1378_v56 = vpop.permute.xlu0 %1377  ;;  %v2071_v28 = vsel %vm2039_vm7, %v2038_v36, %v1394_v38 }
 0x16f   : > { %v2055_v35 = vsel %vm2039_vm7, %v2022_v58, %v1378_v56 }
 0x171   : > { %v1504_v50 = vpop.permute.xlu1 %1503 }
 0x172   : > { %v1488_v32 = vpop.permute.xlu0 %1487  ;;  %v2102_v2 = vsel %vm2072_vm8, %v2069_v42, %v1504_v50 }
 0x173   : > { %v2086_v43 = vsel %vm2072_vm8, %v2053_v60, %v1488_v32 }
 0x175   : > { %v1506_v19 = vpop.permute.xlu1 %1505 }
 0x176   : > { %v1490_v34 = vpop.permute.xlu0 %1489  ;;  %v2104_v22 = vsel %vm2072_vm8, %v2071_v28, %v1506_v19 }
 0x177   : > { %v2088_v63 = vsel %vm2072_vm8, %v2055_v35, %v1490_v34 }
 0x179   : > { %v1776_v53 = vpop.permute.xlu1 %1775 }
 0x17a   : > { %v1760_v9 = vpop.permute.xlu0 %1759  ;;  %v2135_v44 = vsel %vm2105_vm9, %v2102_v2, %v1776_v53 }
 0x17b   : > { %v2119_v40 = vsel %vm2105_vm9, %v2086_v43, %v1760_v9 }
 0x17d   : > { %v1778_v57 = vpop.permute.xlu1 %1777 }
 0x17e   : > { %v1762_v3 = vpop.permute.xlu0 %1761  ;;  %v2137_v17 = vsel %vm2105_vm9, %v2104_v22, %v1778_v57 }
 0x17f   : > { %v2121_v23 = vsel %vm2105_vm9, %v2088_v63, %v1762_v3 }
 0x181   : > { %v1904_v51 = vpop.permute.xlu1 %1903 }
 0x182   : > { %v2168_v54 = vsel %vm2138_vm10, %v2135_v44, %v1904_v51  ;;  %v1888_v11 = vpop.permute.xlu0 %1887 }
 0x183   : > { %v2152_v31 = vsel %vm2138_vm10, %v2119_v40, %v1888_v11  ;;  %2977 = vmatprep.mubr.msk.bf16.mxu1 %vm2198_vm11, %v2168_v54 }
 0x184   : > { %2961 = vmatprep.mubr.msk.bf16.mxu0 %vm2198_vm11, %v2152_v31 }
 0x185   : > { %v1906_v46 = vpop.permute.xlu1 %1905 }
 0x186   : > { %v2170_v29 = vsel %vm2138_vm10, %v2137_v17, %v1906_v46  ;;  %v1890_v4 = vpop.permute.xlu0 %1889 }
 0x187   : > { %v2154_v1 = vsel %vm2138_vm10, %v2121_v23, %v1890_v4  ;;  %2978 = vmatmul.mubr.msk.bf16.gmra.mxu1 %vm2198_vm11, %v2170_v29 }
 0x188   : > { %2962 = vmatmul.mubr.msk.bf16.gmra.mxu0 %vm2198_vm11, %v2154_v1 }
 0x18b   : > { %v2967_v7 = vpop.f32.mrf.mxu1 }
 0x18c   : > { %v2951_v37 = vpop.f32.mrf.mxu0  ;;  %v2342_v18 = vadd.f32 %v2967_v7, %v4464_v45 }
 0x18d   : > { %v2278_v21 = vadd.f32 %v2951_v37, %v4464_v45  ;;  %v2333_v27 = vpop.f32.mrf.mxu1 }
 0x18e   : > { %vm2414_vm12 = vcmp.gt.f32.partialorder %v2342_v18, 0.0  ;;  %v2446_v24 = vmul.f32 0.01, %v2342_v18  ;;  %v2269_v6 = vpop.f32.mrf.mxu0  ;;  %v2334_v48 = vadd.f32 %v4464_v45, %v2333_v27 }
 0x18f   : > { %vm2398_vm13 = vcmp.gt.f32.partialorder %v2278_v21, 0.0  ;;  %v2430_v52 = vmul.f32 0.01, %v2278_v21  ;;  %v2270_v8 = vadd.f32 %v4464_v45, %v2269_v6  ;;  %v2968_v55 = vpop.f32.mrf.mxu1 }
 0x190   : > { %v2478_v5 = vsel %vm2414_vm12, %v2342_v18, %v2446_v24  ;;  %vm2412_vm14 = vcmp.gt.f32.partialorder %v2334_v48, 0.0  ;;  %v2444_v0 = vmul.f32 0.01, %v2334_v48  ;;  %v2952_v15 = vpop.f32.mrf.mxu0  ;;  %v2345_v25 = vadd.f32 %v2968_v55, %v4464_v45 }
 0x191   : > { %v2462_v30 = vsel %vm2398_vm13, %v2278_v21, %v2430_v52  ;;  %2510 = vst [vmem:[%s4472_s16 + $0x90] sm:$0xff] %v2478_v5  ;;  %vm2396_vm15 = vcmp.gt.f32.partialorder %v2270_v8, 0.0  ;;  %v2428_v26 = vmul.f32 0.01, %v2270_v8  ;;  %v2281_v38 = vadd.f32 %v2952_v15, %v4464_v45  ;;  %v2336_v56 = vpop.f32.mrf.mxu1 }
 0x192   : > { %2494 = vst [vmem:[%s4472_s16 + $0x10] sm:$0xff] %v2462_v30  ;;  %v2476_v50 = vsel %vm2412_vm14, %v2334_v48, %v2444_v0  ;;  %vm2415_vm0 = vcmp.gt.f32.partialorder %v2345_v25, 0.0  ;;  %v2447_v32 = vmul.f32 0.01, %v2345_v25  ;;  %v2272_v19 = vpop.f32.mrf.mxu0  ;;  %v2337_v34 = vadd.f32 %v4464_v45, %v2336_v56 }
 0x193   : > { %v2460_v53 = vsel %vm2396_vm15, %v2270_v8, %v2428_v26  ;;  %2508 = vst [vmem:[%s4472_s16 + $0x80] sm:$0xff] %v2476_v50  ;;  %vm2399_vm1 = vcmp.gt.f32.partialorder %v2281_v38, 0.0  ;;  %v2431_v9 = vmul.f32 0.01, %v2281_v38  ;;  %v2273_v13 = vadd.f32 %v4464_v45, %v2272_v19 }
 0x194   : > { %2492 = vst [vmem:[%s4472_s16] sm:$0xff] %v2460_v53  ;;  %v2479_v39 = vsel %vm2415_vm0, %v2345_v25, %v2447_v32  ;;  %vm2413_vm2 = vcmp.gt.f32.partialorder %v2337_v34, 0.0  ;;  %v2445_v59 = vmul.f32 0.01, %v2337_v34 }
 0x195   : > { %v2463_v41 = vsel %vm2399_vm1, %v2281_v38, %v2431_v9  ;;  %2511 = vst [vmem:[%s4472_s16 + $0x98] sm:$0xff] %v2479_v39  ;;  %vm2397_vm3 = vcmp.gt.f32.partialorder %v2273_v13, 0.0  ;;  %v2429_v62 = vmul.f32 0.01, %v2273_v13 }
 0x196   : > { %2495 = vst [vmem:[%s4472_s16 + $0x18] sm:$0xff] %v2463_v41  ;;  %v2477_v57 = vsel %vm2413_vm2, %v2337_v34, %v2445_v59 }
 0x197   : > { %v2461_v20 = vsel %vm2397_vm3, %v2273_v13, %v2429_v62  ;;  %2509 = vst [vmem:[%s4472_s16 + $0x88] sm:$0xff] %v2477_v57 }
 0x198   : > { %2493 = vst [vmem:[%s4472_s16 + $0x8] sm:$0xff] %v2461_v20 }
 0x1cb   : > { %v2971_v61 = vpop.f32.mrf.mxu1 }
 0x1cc   : > { %v2955_v3 = vpop.f32.mrf.mxu0  ;;  %v2358_v33 = vadd.f32 %v2971_v61, %v4464_v45 }
 0x1cd   : > { %v2294_v49 = vadd.f32 %v2955_v3, %v4464_v45  ;;  %v2349_v42 = vpop.f32.mrf.mxu1 }
 0x1ce   : > { %vm2418_vm4 = vcmp.gt.f32.partialorder %v2358_v33, 0.0  ;;  %v2450_v12 = vmul.f32 0.01, %v2358_v33  ;;  %v2285_v47 = vpop.f32.mrf.mxu0  ;;  %v2350_v60 = vadd.f32 %v4464_v45, %v2349_v42 }
 0x1cf   : > { %vm2402_vm5 = vcmp.gt.f32.partialorder %v2294_v49, 0.0  ;;  %v2434_v2 = vmul.f32 0.01, %v2294_v49  ;;  %v2286_v10 = vadd.f32 %v4464_v45, %v2285_v47  ;;  %v2972_v14 = vpop.f32.mrf.mxu1 }
 0x1d0   : > { %v2482_v43 = vsel %vm2418_vm4, %v2358_v33, %v2450_v12  ;;  %vm2416_vm6 = vcmp.gt.f32.partialorder %v2350_v60, 0.0  ;;  %v2448_v44 = vmul.f32 0.01, %v2350_v60  ;;  %v2956_v51 = vpop.f32.mrf.mxu0  ;;  %v2361_v16 = vadd.f32 %v2972_v14, %v4464_v45 }
 0x1d1   : > { %v2466_v36 = vsel %vm2402_vm5, %v2294_v49, %v2434_v2  ;;  %2514 = vst [vmem:[%s4472_s16 + $0xb0] sm:$0xff] %v2482_v43  ;;  %vm2400_vm7 = vcmp.gt.f32.partialorder %v2286_v10, 0.0  ;;  %v2432_v40 = vmul.f32 0.01, %v2286_v10  ;;  %v2297_v54 = vadd.f32 %v2956_v51, %v4464_v45  ;;  %v2352_v11 = vpop.f32.mrf.mxu1 }
 0x1d2   : > { %2498 = vst [vmem:[%s4472_s16 + $0x30] sm:$0xff] %v2466_v36  ;;  %v2480_v58 = vsel %vm2416_vm6, %v2350_v60, %v2448_v44  ;;  %vm2419_vm8 = vcmp.gt.f32.partialorder %v2361_v16, 0.0  ;;  %v2451_v28 = vmul.f32 0.01, %v2361_v16  ;;  %v2288_v31 = vpop.f32.mrf.mxu0  ;;  %v2353_v35 = vadd.f32 %v4464_v45, %v2352_v11 }
 0x1d3   : > { %v2464_v22 = vsel %vm2400_vm7, %v2286_v10, %v2432_v40  ;;  %2512 = vst [vmem:[%s4472_s16 + $0xa0] sm:$0xff] %v2480_v58  ;;  %vm2403_vm9 = vcmp.gt.f32.partialorder %v2297_v54, 0.0  ;;  %v2435_v63 = vmul.f32 0.01, %v2297_v54  ;;  %v2289_v17 = vadd.f32 %v4464_v45, %v2288_v31 }
 0x1d4   : > { %2496 = vst [vmem:[%s4472_s16 + $0x20] sm:$0xff] %v2464_v22  ;;  %v2483_v46 = vsel %vm2419_vm8, %v2361_v16, %v2451_v28  ;;  %vm2417_vm10 = vcmp.gt.f32.partialorder %v2353_v35, 0.0  ;;  %v2449_v23 = vmul.f32 0.01, %v2353_v35 }
 0x1d5   : > { %v2467_v29 = vsel %vm2403_vm9, %v2297_v54, %v2435_v63  ;;  %2515 = vst [vmem:[%s4472_s16 + $0xb8] sm:$0xff] %v2483_v46  ;;  %vm2401_vm11 = vcmp.gt.f32.partialorder %v2289_v17, 0.0  ;;  %v2433_v4 = vmul.f32 0.01, %v2289_v17 }
 0x1d6   : > { %2499 = vst [vmem:[%s4472_s16 + $0x38] sm:$0xff] %v2467_v29  ;;  %v2481_v1 = vsel %vm2417_vm10, %v2353_v35, %v2449_v23 }
 0x1d7   : > { %v2465_v7 = vsel %vm2401_vm11, %v2289_v17, %v2433_v4  ;;  %2513 = vst [vmem:[%s4472_s16 + $0xa8] sm:$0xff] %v2481_v1 }
 0x1d8   : > { %2497 = vst [vmem:[%s4472_s16 + $0x28] sm:$0xff] %v2465_v7 }
 0x20b   : > { %v2975_v37 = vpop.f32.mrf.mxu1 }
 0x20c   : > { %v2959_v18 = vpop.f32.mrf.mxu0  ;;  %v2374_v21 = vadd.f32 %v2975_v37, %v4464_v45 }
 0x20d   : > { %v2310_v27 = vadd.f32 %v2959_v18, %v4464_v45  ;;  %v2365_v24 = vpop.f32.mrf.mxu1 }
 0x20e   : > { %vm2422_vm12 = vcmp.gt.f32.partialorder %v2374_v21, 0.0  ;;  %v2454_v6 = vmul.f32 0.01, %v2374_v21  ;;  %v2301_v48 = vpop.f32.mrf.mxu0  ;;  %v2366_v52 = vadd.f32 %v4464_v45, %v2365_v24 }
 0x20f   : > { %vm2406_vm13 = vcmp.gt.f32.partialorder %v2310_v27, 0.0  ;;  %v2438_v8 = vmul.f32 0.01, %v2310_v27  ;;  %v2302_v55 = vadd.f32 %v4464_v45, %v2301_v48  ;;  %v2976_v5 = vpop.f32.mrf.mxu1 }
 0x210   : > { %v2486_v0 = vsel %vm2422_vm12, %v2374_v21, %v2454_v6  ;;  %vm2420_vm14 = vcmp.gt.f32.partialorder %v2366_v52, 0.0  ;;  %v2452_v15 = vmul.f32 0.01, %v2366_v52  ;;  %v2960_v25 = vpop.f32.mrf.mxu0  ;;  %v2377_v30 = vadd.f32 %v2976_v5, %v4464_v45 }
 0x211   : > { %v2470_v26 = vsel %vm2406_vm13, %v2310_v27, %v2438_v8  ;;  %2518 = vst [vmem:[%s4472_s16 + $0xd0] sm:$0xff] %v2486_v0  ;;  %vm2404_vm15 = vcmp.gt.f32.partialorder %v2302_v55, 0.0  ;;  %v2436_v38 = vmul.f32 0.01, %v2302_v55  ;;  %v2313_v56 = vadd.f32 %v2960_v25, %v4464_v45  ;;  %v2368_v50 = vpop.f32.mrf.mxu1 }
 0x212   : > { %2502 = vst [vmem:[%s4472_s16 + $0x50] sm:$0xff] %v2470_v26  ;;  %v2484_v32 = vsel %vm2420_vm14, %v2366_v52, %v2452_v15  ;;  %vm2423_vm0 = vcmp.gt.f32.partialorder %v2377_v30, 0.0  ;;  %v2455_v19 = vmul.f32 0.01, %v2377_v30  ;;  %v2304_v34 = vpop.f32.mrf.mxu0  ;;  %v2369_v53 = vadd.f32 %v4464_v45, %v2368_v50 }
 0x213   : > { %v2468_v9 = vsel %vm2404_vm15, %v2302_v55, %v2436_v38  ;;  %2516 = vst [vmem:[%s4472_s16 + $0xc0] sm:$0xff] %v2484_v32  ;;  %vm2407_vm1 = vcmp.gt.f32.partialorder %v2313_v56, 0.0  ;;  %v2439_v13 = vmul.f32 0.01, %v2313_v56  ;;  %v2305_v39 = vadd.f32 %v4464_v45, %v2304_v34 }
 0x214   : > { %2500 = vst [vmem:[%s4472_s16 + $0x40] sm:$0xff] %v2468_v9  ;;  %v2487_v59 = vsel %vm2423_vm0, %v2377_v30, %v2455_v19  ;;  %vm2421_vm2 = vcmp.gt.f32.partialorder %v2369_v53, 0.0  ;;  %v2453_v41 = vmul.f32 0.01, %v2369_v53 }
 0x215   : > { %v2471_v62 = vsel %vm2407_vm1, %v2313_v56, %v2439_v13  ;;  %2519 = vst [vmem:[%s4472_s16 + $0xd8] sm:$0xff] %v2487_v59  ;;  %vm2405_vm3 = vcmp.gt.f32.partialorder %v2305_v39, 0.0  ;;  %v2437_v57 = vmul.f32 0.01, %v2305_v39 }
 0x216   : > { %2503 = vst [vmem:[%s4472_s16 + $0x58] sm:$0xff] %v2471_v62  ;;  %v2485_v20 = vsel %vm2421_vm2, %v2369_v53, %v2453_v41 }
 0x217   : > { %v2469_v61 = vsel %vm2405_vm3, %v2305_v39, %v2437_v57  ;;  %2517 = vst [vmem:[%s4472_s16 + $0xc8] sm:$0xff] %v2485_v20 }
 0x218   : > { %2501 = vst [vmem:[%s4472_s16 + $0x48] sm:$0xff] %v2469_v61 }
 0x247   : > { %v2979_v3 = vpop.f32.mrf.mxu1 }
 0x248   : > { %v2963_v33 = vpop.f32.mrf.mxu0  ;;  %v2390_v49 = vadd.f32 %v2979_v3, %v4464_v45 }
 0x249   : > { %v2326_v42 = vadd.f32 %v2963_v33, %v4464_v45  ;;  %v2381_v12 = vpop.f32.mrf.mxu1 }
 0x24a   : > { %vm2426_vm4 = vcmp.gt.f32.partialorder %v2390_v49, 0.0  ;;  %v2458_v47 = vmul.f32 0.01, %v2390_v49  ;;  %v2317_v60 = vpop.f32.mrf.mxu0  ;;  %v2382_v2 = vadd.f32 %v4464_v45, %v2381_v12 }
 0x24b   : > { %vm2410_vm5 = vcmp.gt.f32.partialorder %v2326_v42, 0.0  ;;  %v2442_v10 = vmul.f32 0.01, %v2326_v42  ;;  %v2318_v14 = vadd.f32 %v4464_v45, %v2317_v60  ;;  %v2980_v43 = vpop.f32.mrf.mxu1 }
 0x24c   : > { %v2490_v44 = vsel %vm2426_vm4, %v2390_v49, %v2458_v47  ;;  %vm2424_vm6 = vcmp.gt.f32.partialorder %v2382_v2, 0.0  ;;  %v2456_v51 = vmul.f32 0.01, %v2382_v2  ;;  %v2964_v16 = vpop.f32.mrf.mxu0  ;;  %v2393_v36 = vadd.f32 %v2980_v43, %v4464_v45 }
 0x24d   : > { %v2474_v40 = vsel %vm2410_vm5, %v2326_v42, %v2442_v10  ;;  %2522 = vst [vmem:[%s4472_s16 + $0xf0] sm:$0xff] %v2490_v44  ;;  %vm2408_vm7 = vcmp.gt.f32.partialorder %v2318_v14, 0.0  ;;  %v2440_v54 = vmul.f32 0.01, %v2318_v14  ;;  %v2329_v11 = vadd.f32 %v2964_v16, %v4464_v45  ;;  %v2384_v58 = vpop.f32.mrf.mxu1 }
 0x24e   : > { %2506 = vst [vmem:[%s4472_s16 + $0x70] sm:$0xff] %v2474_v40  ;;  %v2488_v28 = vsel %vm2424_vm6, %v2382_v2, %v2456_v51  ;;  %vm2427_vm8 = vcmp.gt.f32.partialorder %v2393_v36, 0.0  ;;  %v2459_v31 = vmul.f32 0.01, %v2393_v36  ;;  %v2320_v35 = vpop.f32.mrf.mxu0  ;;  %v2385_v22 = vadd.f32 %v4464_v45, %v2384_v58 }
 0x24f   : > { %v2472_v63 = vsel %vm2408_vm7, %v2318_v14, %v2440_v54  ;;  %2520 = vst [vmem:[%s4472_s16 + $0xe0] sm:$0xff] %v2488_v28  ;;  %vm2411_vm9 = vcmp.gt.f32.partialorder %v2329_v11, 0.0  ;;  %v2443_v17 = vmul.f32 0.01, %v2329_v11  ;;  %v2321_v46 = vadd.f32 %v4464_v45, %v2320_v35 }
 0x250   : > { %2504 = vst [vmem:[%s4472_s16 + $0x60] sm:$0xff] %v2472_v63  ;;  %v2491_v23 = vsel %vm2427_vm8, %v2393_v36, %v2459_v31  ;;  %vm2425_vm10 = vcmp.gt.f32.partialorder %v2385_v22, 0.0  ;;  %v2457_v29 = vmul.f32 0.01, %v2385_v22 }
 0x251   : > { %v2475_v4 = vsel %vm2411_vm9, %v2329_v11, %v2443_v17  ;;  %2523 = vst [vmem:[%s4472_s16 + $0xf8] sm:$0xff] %v2491_v23  ;;  %vm2409_vm11 = vcmp.gt.f32.partialorder %v2321_v46, 0.0  ;;  %v2441_v1 = vmul.f32 0.01, %v2321_v46 }
 0x252   : > { %2507 = vst [vmem:[%s4472_s16 + $0x78] sm:$0xff] %v2475_v4  ;;  %v2489_v7 = vsel %vm2425_vm10, %v2385_v22, %v2457_v29 }
 0x253   : > { %v2473_v37 = vsel %vm2409_vm11, %v2321_v46, %v2441_v1  ;;  %2521 = vst [vmem:[%s4472_s16 + $0xe8] sm:$0xff] %v2489_v7 }
 0x254   : > { %2505 = vst [vmem:[%s4472_s16 + $0x68] sm:$0xff] %v2473_v37 }
 0x255 PF: > { %s13_s14 = sadd.s32 1, %s3191_s14   ;;  %s4564_s12 = smov %s3187_s13 }
 0x256   : > { %p10_p5 = scmp.ge.s32.totalorder %s13_s14, 4   ;;  %s4565_s13 = smov %s4567_s15 }
 0x258   :  { %12 = sbr.rel (!%p10_p5) target bundleno = 2 (0x2), region = 65 }

</bundles_post_ra>
